<compile_context>
chip_gen: v7x
topology: tpu7x:2x2x1
jax: 0.10.0
libtpu: 0.0.40
codegen_flags: <defaults>
</compile_context>

<pallas_src>
import functools

import jax
import jax.numpy as jnp
from jax.experimental import pallas as pl
from jax.experimental.pallas import tpu as pltpu

EPS = 1e-5
LANE = 128


def _round_up(x, m):
    return (x + m - 1) // m * m


@functools.lru_cache(maxsize=None)
def _vmem_limit_bytes():
    """Per-generation scoped-VMEM limit: ~96 MiB on v5e/v6e (128 MiB physical VMEM),
    32 MiB on v7x (64 MiB physical) or when the query is unavailable."""
    try:
        cap = int(pltpu.get_tpu_info().vmem_capacity_bytes)
    except Exception:
        cap = 0
    if cap >= 100 * 1024 * 1024:
        return 96 * 1024 * 1024
    return 32 * 1024 * 1024


def _largest_divisor_tile(h, bytes_per_row, budget):
    # TODO(synk): prime H degrades to tile_h=1; a cdiv grid with a masked last tile
    # (and masked BN partials) would avoid that cliff.
    best = 1
    for th in range(1, h + 1):
        if h % th == 0 and th * bytes_per_row <= budget:
            best = th
    return best


# -----------------------------------------------------------------------------------
# Kernel A/B: optional per-channel affine(+ReLU) on the input (fused BN of the producer)
# -> 3x3 conv as 3 accumulated MXU matmuls (one per dx tap column, K = 3*Cin, bf16
# operands, f32 accumulate) -> per-tile BN sum / sum-of-squares from the f32 accumulator
# -> bf16 writeback of the raw conv output.
# -----------------------------------------------------------------------------------
def _conv_stats_kernel(x_ref, xt_ref, xb_ref, scale_ref, shift_ref, w_ref,
                       z_ref, stats_ref, *, apply_input_affine, apply_input_relu,
                       mm_dtype):
    i = pl.program_id(1)
    n_tiles = pl.num_programs(1)
    th, w, c = x_ref.shape
    _, k_dx, cout = w_ref.shape

    if apply_input_affine:
        scale = scale_ref[...].reshape(1, 1, c)
        shift = shift_ref[...].reshape(1, 1, c)

    def prep(v, valid=None):
        y = v.astype(jnp.float32)                 # affine math stays in f32 (v5e VPU)
        if apply_input_affine:
            y = y * scale + shift
        if apply_input_relu:
            y = jnp.maximum(y, 0.0)
        if valid is not None:                     # zero the halo row outside the image
            y = y * valid.astype(jnp.float32)     # (conv zero-pad happens AFTER BN+ReLU)
        return y.astype(mm_dtype)                 # cast at the matmul-operand boundary

    top = prep(xt_ref[...], valid=(i > 0))
    bot = prep(xb_ref[...], valid=(i + 1 < n_tiles))
    mid = prep(x_ref[...])

    xh = jnp.concatenate([top, mid, bot], axis=0)                 # (th+2, w, c)
    zc = jnp.zeros((th + 2, 1, c), mm_dtype)
    xh = jnp.concatenate([zc, xh, zc], axis=1)                    # (th+2, w+2, c)

    rows = th * w
    kpad = k_dx - 3 * c
    acc = None
    for dx in range(3):                                           # 3 matmuls, K = 3*c
        p = jnp.concatenate([xh[dy:dy + th, dx:dx + w, :] for dy in range(3)], axis=-1)
        p = p.reshape(rows, 3 * c)
        if kpad:                                                  # align K to 128 lanes
            p = jnp.concatenate([p, jnp.zeros((rows, kpad), mm_dtype)], axis=-1)
        d = jnp.dot(p, w_ref[dx], preferred_element_type=jnp.float32)
        acc = d if acc is None else acc + d                       # (rows, cout) f32

    # BatchNorm statistics from the f32 accumulator (per-tile partials).
    s = jnp.sum(acc, axis=0, keepdims=True)
    ss = jnp.sum(acc * acc, axis=0, keepdims=True)
    stats_ref[...] = jnp.concatenate([s, ss], axis=0)             # (2, cout)

    z_ref[...] = acc.reshape(th, w, cout).astype(z_ref.dtype)     # bf16, lane-dense


def _conv_stats_pass(x, scale, shift, w_folded, *, apply_input_affine,
                     apply_input_relu, mm_dtype, vmem_limit):
    n, h, w, c = x.shape
    _, k_dx, cout = w_folded.shape
    in_bytes = jnp.dtype(x.dtype).itemsize

    # VMEM-budgeted row tile (per grid step; batch is split onto its own grid axis).
    budget = int(0.7 * vmem_limit)
    fixed = (2 * 3 * k_dx * cout * 2                  # double-buffered folded weights
             + 4 * (w + 2) * c * (in_bytes + 2)       # halo rows (input + bf16 prep)
             + 4 * 2 * cout * 4)                      # stats blocks
    bytes_per_row = ((w + 2) * c * 2                  # haloed bf16 tile
                     + w * (c * 2 * in_bytes          # double-buffered input block
                            + k_dx * 2 * 2            # per-dx patch (with margin)
                            + cout * 4                # f32 accumulator
                            + cout * 2 * 2))          # double-buffered bf16 output
    tile_h = _largest_divisor_tile(h, bytes_per_row, max(budget - fixed, bytes_per_row))
    n_tiles = h // tile_h

    kernel = functools.partial(_conv_stats_kernel,
                               apply_input_affine=apply_input_affine,
                               apply_input_relu=apply_input_relu,
                               mm_dtype=mm_dtype)
    z, stats = pl.pallas_call(
        kernel,
        grid=(n, n_tiles),
        in_specs=[
            pl.BlockSpec((None, tile_h, w, c), lambda b, i: (b, i, 0, 0)),
            # 1-row top / bottom halo views of the SAME array (clamped at the border;
            # the kernel zeroes the out-of-image case).
            pl.BlockSpec((None, 1, w, c),
                         lambda b, i: (b, jnp.maximum(i * tile_h - 1, 0), 0, 0)),
            pl.BlockSpec((None, 1, w, c),
                         lambda b, i: (b, jnp.minimum((i + 1) * tile_h, h - 1), 0, 0)),
            pl.BlockSpec((1, c), lambda b, i: (0, 0)),
            pl.BlockSpec((1, c), lambda b, i: (0, 0)),
            pl.BlockSpec((3, k_dx, cout), lambda b, i: (0, 0, 0)),
        ],
        out_specs=[
            pl.BlockSpec((None, tile_h, w, cout), lambda b, i: (b, i, 0, 0)),
            pl.BlockSpec((None, None, 2, cout), lambda b, i: (b, i, 0, 0)),
        ],
        out_shape=[
            jax.ShapeDtypeStruct((n, h, w, cout), mm_dtype),          # bf16 intermediate
            jax.ShapeDtypeStruct((n, n_tiles, 2, cout), jnp.float32),  # BN partials
        ],
        compiler_params=pltpu.CompilerParams(
            dimension_semantics=("parallel", "parallel"),
            vmem_limit_bytes=vmem_limit),
    )(x, x, x, scale, shift, w_folded)
    return z, stats


# -----------------------------------------------------------------------------------
# Pass C (only at true block outputs): folded BatchNorm (scale/shift) + ReLU.
# -----------------------------------------------------------------------------------
def _bn_relu_kernel(z_ref, scale_ref, shift_ref, o_ref):
    z = z_ref[...].astype(jnp.float32)
    o_ref[...] = jnp.maximum(z * scale_ref[...] + shift_ref[...], 0.0)


def _bn_relu_pass(z, scale, shift, *, vmem_limit):
    n, h, w, c = z.shape
    budget = int(0.7 * vmem_limit)
    bytes_per_row = w * c * (2 * 2 + 2 * 4)
    tile_h = _largest_divisor_tile(h, bytes_per_row, max(budget, bytes_per_row))
    n_tiles = h // tile_h
    return pl.pallas_call(
        _bn_relu_kernel,
        grid=(n, n_tiles),
        in_specs=[
            pl.BlockSpec((None, tile_h, w, c), lambda b, i: (b, i, 0, 0)),
            pl.BlockSpec((1, c), lambda b, i: (0, 0)),
            pl.BlockSpec((1, c), lambda b, i: (0, 0)),
        ],
        out_specs=pl.BlockSpec((None, tile_h, w, c), lambda b, i: (b, i, 0, 0)),
        out_shape=jax.ShapeDtypeStruct((n, h, w, c), jnp.float32),
        compiler_params=pltpu.CompilerParams(
            dimension_semantics=("parallel", "parallel"),
            vmem_limit_bytes=vmem_limit),
    )(z, scale, shift)


def _finalize_bn(stats, gamma_p, beta_p, count):
    """Reduce per-tile (sum, sum^2) partials and fold gamma*rsqrt(var+eps) into one
    per-channel scale/shift (training-mode batch stats, biased variance, eps=1e-5)."""
    s = jnp.sum(stats[..., 0, :], axis=(0, 1))
    ss = jnp.sum(stats[..., 1, :], axis=(0, 1))
    mean = s / count
    var = jnp.maximum(ss / count - mean * mean, 0.0)
    scale = gamma_p * jax.lax.rsqrt(var + EPS)
    shift = beta_p - mean * scale
    return (scale.reshape(1, -1).astype(jnp.float32),
            shift.reshape(1, -1).astype(jnp.float32))


# -----------------------------------------------------------------------------------
# Parameters
# -----------------------------------------------------------------------------------
def init_vgg_params(key, in_channels, middle_channels, out_channels):
    """Raw parameters; conv weights stored in HWIO (= PyTorch OIHW transposed (2,3,1,0))."""
    k = jax.random.split(key, 8)
    w1 = jax.random.normal(k[0], (3, 3, in_channels, middle_channels), jnp.float32) * 0.1
    b1 = jax.random.normal(k[1], (middle_channels,), jnp.float32) * 0.1
    g1 = 1.0 + 0.1 * jax.random.normal(k[2], (middle_channels,), jnp.float32)
    be1 = 0.1 * jax.random.normal(k[3], (middle_channels,), jnp.float32)
    w2 = jax.random.normal(k[4], (3, 3, middle_channels, out_channels), jnp.float32) * 0.1
    b2 = jax.random.normal(k[5], (out_channels,), jnp.float32) * 0.1
    g2 = 1.0 + 0.1 * jax.random.normal(k[6], (out_channels,), jnp.float32)
    be2 = 0.1 * jax.random.normal(k[7], (out_channels,), jnp.float32)
    return (w1, b1, g1, be1, w2, b2, g2, be2)


def _fold_weight_dx(w_hwio, cout_pad):
    """(3,3,cin,cout) HWIO -> (3, round_up(3*cin,128), cout_pad): one zero-padded K slab
    per dx tap column, row index = dy*cin + ci (matches the in-kernel dy-concat patch)."""
    kh, kw, cin, cout = w_hwio.shape
    k_dx = _round_up(kh * cin, LANE)
    wf = jnp.transpose(w_hwio, (1, 0, 2, 3)).reshape(kw, kh * cin, cout)
    return jnp.pad(wf, ((0, 0), (0, k_dx - kh * cin), (0, cout_pad - cout)))


def prepare_vgg_params(raw_params, in_channels_padded=None, lane=LANE):
    """Fold conv weights for the dx-slab kernel (bf16) and pad channels to a multiple of
    128.  Padded gamma/beta are zero so padded lanes stay exactly zero end-to-end.  Conv
    biases are dropped: they are cancelled exactly by the training-mode mean subtraction.
    `in_channels_padded` lets a block consume a previous block's channel-padded output."""
    w1, _b1, g1, be1, w2, _b2, g2, be2 = raw_params
    cin = w1.shape[2]
    cmid, cout = w1.shape[3], w2.shape[3]
    cin_p = cin if in_channels_padded is None else in_channels_padded
    cmid_p, cout_p = _round_up(cmid, lane), _round_up(cout, lane)

    w1p = jnp.pad(w1, ((0, 0), (0, 0), (0, cin_p - cin), (0, 0)))
    w1f = _fold_weight_dx(w1p, cmid_p).astype(jnp.bfloat16)       # (3, K1, cmid_p)
    w2p = jnp.pad(w2, ((0, 0), (0, 0), (0, cmid_p - cmid), (0, 0)))
    w2f = _fold_weight_dx(w2p, cout_p).astype(jnp.bfloat16)       # (3, K2, cout_p)

    pad1, pad2 = (0, cmid_p - cmid), (0, cout_p - cout)
    return dict(
        w1f=w1f, g1=jnp.pad(g1, pad1), be1=jnp.pad(be1, pad1),
        w2f=w2f, g2=jnp.pad(g2, pad2), be2=jnp.pad(be2, pad2),
        cin=cin, cin_p=cin_p, cmid_p=cmid_p, cout=cout, cout_p=cout_p,
    )


# -----------------------------------------------------------------------------------
# VGGBlock forward
# -----------------------------------------------------------------------------------
def vgg_block_nhwc(x, prep, *, in_scale=None, in_shift=None, in_relu=False,
                   finalize=True, mm_dtype=jnp.bfloat16):
    """x: (N, H, W, Cin_p) NHWC.  If (in_scale, in_shift, in_relu) are given they are a
    deferred BN+ReLU of the producer and are applied on the fly in pass A (no standalone
    pass for the producer's output).  If finalize=False, returns (z2_bf16, scale2,
    shift2) for the next block to fuse; otherwise returns the f32 activation with
    channels padded to cout_p (padded lanes are exactly zero)."""
    n, h, w, c = x.shape
    assert c == prep["cin_p"], "input channels must match the prepared weights"
    vmem_limit = _vmem_limit_bytes()
    count = float(n * h * w)

    if in_scale is None:
        in_scale = jnp.ones((1, c), jnp.float32)
        in_shift = jnp.zeros((1, c), jnp.float32)
        affine_a = False
    else:
        in_scale = in_scale.reshape(1, c).astype(jnp.float32)
        in_shift = in_shift.reshape(1, c).astype(jnp.float32)
        affine_a = True

    # pass A: (optional producer BN+ReLU) -> conv1 + BN1 statistics
    z1, st1 = _conv_stats_pass(x, in_scale, in_shift, prep["w1f"],
                               apply_input_affine=affine_a, apply_input_relu=in_relu,
                               mm_dtype=mm_dtype, vmem_limit=vmem_limit)
    scale1, shift1 = _finalize_bn(st1, prep["g1"], prep["be1"], count)

    # pass B: BN1+ReLU on the fly -> conv2 + BN2 statistics
    z2, st2 = _conv_stats_pass(z1, scale1, shift1, prep["w2f"],
                               apply_input_affine=True, apply_input_relu=True,
                               mm_dtype=mm_dtype, vmem_limit=vmem_limit)
    scale2, shift2 = _finalize_bn(st2, prep["g2"], prep["be2"], count)

    if finalize:
        return _bn_relu_pass(z2, scale2, shift2, vmem_limit=vmem_limit)
    return z2, scale2, shift2


def vgg_block_nchw(x_nchw, raw_params, *, mm_dtype=jnp.bfloat16):
    """PyTorch-layout convenience wrapper (single NCHW<->NHWC conversion at the module
    boundary; inside a full NestedUnet keep everything NHWC + channel-padded)."""
    prep = prepare_vgg_params(raw_params)
    x = jnp.transpose(x_nchw, (0, 2, 3, 1))
    y = vgg_block_nhwc(x, prep, mm_dtype=mm_dtype)
    return jnp.transpose(y[..., :prep["cout"]], (0, 3, 1, 2))


# -----------------------------------------------------------------------------------
# Pure-JAX reference (PyTorch semantics with bf16 conv operands / f32 accumulate)
# -----------------------------------------------------------------------------------
def reference_vgg_block_nchw(x_nchw, raw_params, *, mm_dtype=jnp.bfloat16):
    w1, b1, g1, be1, w2, b2, g2, be2 = raw_params
    x = jnp.transpose(x_nchw, (0, 2, 3, 1)).astype(jnp.float32)

    def conv_bn_relu(x, w, b, g, be):
        y = jax.lax.conv_general_dilated(
            x.astype(mm_dtype), w.astype(mm_dtype), (1, 1), "SAME",
            dimension_numbers=("NHWC", "HWIO", "NHWC"),
            preferred_element_type=jnp.float32)
        y = y + b.reshape(1, 1, 1, -1)
        mean = jnp.mean(y, axis=(0, 1, 2))
        var = jnp.mean((y - mean) ** 2, axis=(0, 1, 2))
        y = (y - mean) * jax.lax.rsqrt(var + EPS) * g.reshape(1, 1, 1, -1) \
            + be.reshape(1, 1, 1, -1)
        return jnp.maximum(y, 0.0)

    y = conv_bn_relu(x, w1, b1, g1, be1)
    y = conv_bn_relu(y, w2, b2, g2, be2)
    return jnp.transpose(y, (0, 3, 1, 2))


if __name__ == "__main__":
    key = jax.random.PRNGKey(0)
    kx1, kp1, kx2, kp2, kpA, kpB = jax.random.split(key, 6)

    # Tolerances are set for bf16 conv operands + bf16 intermediate activation storage
    # (the reference stores the intermediates in f32), outputs are O(1) post-BN+ReLU.

    # Config 1: the first NestedUnet block, VGGBlock(4, 32, 32) at 16x16, batch 2.
    N, CIN, H, W = 2, 4, 16, 16
    x1 = jax.random.normal(kx1, (N, CIN, H, W), jnp.float32)
    p1 = init_vgg_params(kp1, CIN, 32, 32)
    out1 = jax.block_until_ready(vgg_block_nchw(x1, p1))
    ref1 = reference_vgg_block_nchw(x1, p1)
    assert out1.shape == (N, 32, H, W)
    assert bool(jnp.isfinite(out1).all())
    assert float(jnp.max(jnp.abs(ref1))) > 1e-2
    err1 = float(jnp.max(jnp.abs(out1 - ref1)))
    merr1 = float(jnp.mean(jnp.abs(out1 - ref1)))
    assert err1 < 6e-2 and merr1 < 2e-2, f"config1 err max={err1} mean={merr1}"

    # Config 2: a concat-input block shape (like VGGBlock(32+64, 32, 32)) at 8x8
    # (single row tile -> both halo masks active; exercises the K-padding path).
    x2 = jax.random.normal(kx2, (2, 96, 8, 8), jnp.float32)
    p2 = init_vgg_params(kp2, 96, 32, 32)
    out2 = jax.block_until_ready(vgg_block_nchw(x2, p2))
    ref2 = reference_vgg_block_nchw(x2, p2)
    assert out2.shape == (2, 32, 8, 8)
    err2 = float(jnp.max(jnp.abs(out2 - ref2)))
    assert err2 < 6e-2, f"config2 max abs err = {err2}"

    # Config 3: two chained blocks with block A's BN2+ReLU folded into block B's input
    # prep (pass C eliminated for the intermediate activation, as in a real NestedUnet
    # chain of VGGBlocks).
    pA = init_vgg_params(kpA, CIN, 32, 32)
    pB = init_vgg_params(kpB, 32, 32, 32)
    prepA = prepare_vgg_params(pA)
    prepB = prepare_vgg_params(pB, in_channels_padded=prepA["cout_p"])
    x_nhwc = jnp.transpose(x1, (0, 2, 3, 1))
    zA, sA, shA = vgg_block_nhwc(x_nhwc, prepA, finalize=False)
    yB = vgg_block_nhwc(zA, prepB, in_scale=sA, in_shift=shA, in_relu=True)
    out3 = jax.block_until_ready(jnp.transpose(yB[..., :prepB["cout"]], (0, 3, 1, 2)))
    ref3 = reference_vgg_block_nchw(reference_vgg_block_nchw(x1, pA), pB)
    assert out3.shape == (N, 32, H, W)
    assert bool(jnp.isfinite(out3).all())
    err3 = float(jnp.max(jnp.abs(out3 - ref3)))
    merr3 = float(jnp.mean(jnp.abs(out3 - ref3)))
    assert err3 < 1.5e-1 and merr3 < 3e-2, f"config3 err max={err3} mean={merr3}"

    print("KERNEL_OK")
</pallas_src>

<mosaic_0001>
module attributes {stable_mosaic.version = 11 : i64} {
  func.func @_conv_stats_kernel(%arg0: i32, %arg1: i32, %arg2: memref<1x16x16x4xf32, #tpu.memory_space<vmem>>, %arg3: memref<1x1x16x4xf32, #tpu.memory_space<vmem>>, %arg4: memref<1x1x16x4xf32, #tpu.memory_space<vmem>>, %arg5: memref<1x4xf32, #tpu.memory_space<vmem>>, %arg6: memref<1x4xf32, #tpu.memory_space<vmem>>, %arg7: memref<3x128x128xbf16, #tpu.memory_space<vmem>>, %arg8: memref<1x16x16x128xbf16, #tpu.memory_space<vmem>>, %arg9: memref<1x1x2x128xf32, #tpu.memory_space<vmem>>) attributes {dimension_semantics = [#tpu.dimension_semantics<parallel>, #tpu.dimension_semantics<parallel>], iteration_bounds = array<i64: 2, 1>, scalar_prefetch = 0 : i64, scratch_operands = 0 : i64, tpu.core_type = #tpu.core_type<tc>, window_params = [{transform_indices = @transform_0, window_bounds = array<i64: 1, 16, 16, 4>}, {transform_indices = @transform_1, window_bounds = array<i64: 1, 1, 16, 4>}, {transform_indices = @transform_2, window_bounds = array<i64: 1, 1, 16, 4>}, {pipeline_mode = #tpu.pipeline_mode<synchronous>, transform_indices = @transform_3, window_bounds = array<i64: 1, 4>}, {pipeline_mode = #tpu.pipeline_mode<synchronous>, transform_indices = @transform_4, window_bounds = array<i64: 1, 4>}, {pipeline_mode = #tpu.pipeline_mode<synchronous>, transform_indices = @transform_5, window_bounds = array<i64: 3, 128, 128>}, {transform_indices = @transform_6, window_bounds = array<i64: 1, 16, 16, 128>}, {transform_indices = @transform_7, window_bounds = array<i64: 1, 1, 2, 128>}]} {
    %c0 = arith.constant 0 : index
    %c0_0 = arith.constant 0 : index
    %c0_1 = arith.constant 0 : index
    %c0_2 = arith.constant 0 : index
    %0 = vector.load %arg3[%c0, %c0_0, %c0_1, %c0_2] : memref<1x1x16x4xf32, #tpu.memory_space<vmem>>, vector<1x1x16x4xf32>
    %1 = vector.shape_cast %0 : vector<1x1x16x4xf32> to vector<1x16x4xf32>
    %c0_i32 = arith.constant 0 : i32
    %2 = arith.cmpi sgt, %arg1, %c0_i32 : i32
    %3 = arith.extui %2 : i1 to i32
    %4 = arith.sitofp %3 : i32 to f32
    %5 = vector.broadcast %4 : f32 to vector<1x16x4xf32>
    %6 = arith.mulf %1, %5 : vector<1x16x4xf32>
    %7 = arith.truncf %6 : vector<1x16x4xf32> to vector<1x16x4xbf16>
    %c0_3 = arith.constant 0 : index
    %c0_4 = arith.constant 0 : index
    %c0_5 = arith.constant 0 : index
    %c0_6 = arith.constant 0 : index
    %8 = vector.load %arg4[%c0_3, %c0_4, %c0_5, %c0_6] : memref<1x1x16x4xf32, #tpu.memory_space<vmem>>, vector<1x1x16x4xf32>
    %9 = vector.shape_cast %8 : vector<1x1x16x4xf32> to vector<1x16x4xf32>
    %c1_i32 = arith.constant 1 : i32
    %10 = arith.addi %arg1, %c1_i32 : i32
    %c1_i32_7 = arith.constant 1 : i32
    %11 = arith.cmpi slt, %10, %c1_i32_7 : i32
    %12 = arith.extui %11 : i1 to i32
    %13 = arith.sitofp %12 : i32 to f32
    %14 = vector.broadcast %13 : f32 to vector<1x16x4xf32>
    %15 = arith.mulf %9, %14 : vector<1x16x4xf32>
    %16 = arith.truncf %15 : vector<1x16x4xf32> to vector<1x16x4xbf16>
    %c0_8 = arith.constant 0 : index
    %c0_9 = arith.constant 0 : index
    %c0_10 = arith.constant 0 : index
    %c0_11 = arith.constant 0 : index
    %17 = vector.load %arg2[%c0_8, %c0_9, %c0_10, %c0_11] : memref<1x16x16x4xf32, #tpu.memory_space<vmem>>, vector<1x16x16x4xf32>
    %18 = vector.shape_cast %17 : vector<1x16x16x4xf32> to vector<16x16x4xf32>
    %19 = arith.truncf %18 : vector<16x16x4xf32> to vector<16x16x4xbf16>
    %20 = tpu.concatenate %7, %19, %16 in 0 : vector<1x16x4xbf16>, vector<16x16x4xbf16>, vector<1x16x4xbf16> -> vector<18x16x4xbf16>
    %cst = arith.constant 0.000000e+00 : bf16
    %21 = vector.broadcast %cst : bf16 to vector<18x1x4xbf16>
    %22 = tpu.concatenate %21, %20, %21 in 1 : vector<18x1x4xbf16>, vector<18x16x4xbf16>, vector<18x1x4xbf16> -> vector<18x18x4xbf16>
    %23 = vector.extract_strided_slice %22 {offsets = [0, 0, 0], sizes = [16, 16, 4], strides = [1, 1, 1]} : vector<18x18x4xbf16> to vector<16x16x4xbf16>
    %24 = vector.extract_strided_slice %22 {offsets = [1, 0, 0], sizes = [16, 16, 4], strides = [1, 1, 1]} : vector<18x18x4xbf16> to vector<16x16x4xbf16>
    %25 = vector.extract_strided_slice %22 {offsets = [2, 0, 0], sizes = [16, 16, 4], strides = [1, 1, 1]} : vector<18x18x4xbf16> to vector<16x16x4xbf16>
    %26 = tpu.concatenate %23, %24, %25 in 2 : vector<16x16x4xbf16>, vector<16x16x4xbf16>, vector<16x16x4xbf16> -> vector<16x16x12xbf16>
    %27 = vector.shape_cast %26 : vector<16x16x12xbf16> to vector<256x12xbf16>
    %cst_12 = arith.constant 0.000000e+00 : bf16
    %28 = vector.broadcast %cst_12 : bf16 to vector<256x116xbf16>
    %29 = tpu.concatenate %27, %28 in 1 : vector<256x12xbf16>, vector<256x116xbf16> -> vector<256x128xbf16>
    %c0_13 = arith.constant 0 : index
    %c0_14 = arith.constant 0 : index
    %c0_15 = arith.constant 0 : index
    %30 = vector.load %arg7[%c0_13, %c0_14, %c0_15] : memref<3x128x128xbf16, #tpu.memory_space<vmem>>, vector<1x128x128xbf16>
    %31 = vector.shape_cast %30 : vector<1x128x128xbf16> to vector<128x128xbf16>
    %cst_16 = arith.constant dense<0.000000e+00> : vector<256x128xf32>
    %32 = tpu.matmul %29, %31, %cst_16 {dimension_numbers = #tpu.dot_dimension_numbers<[1], [0], [0], [1], [0, 0, 1, 1], [], []>} : vector<256x128xbf16>, vector<128x128xbf16>, vector<256x128xf32> -> vector<256x128xf32>
    %33 = vector.extract_strided_slice %22 {offsets = [0, 1, 0], sizes = [16, 16, 4], strides = [1, 1, 1]} : vector<18x18x4xbf16> to vector<16x16x4xbf16>
    %34 = vector.extract_strided_slice %22 {offsets = [1, 1, 0], sizes = [16, 16, 4], strides = [1, 1, 1]} : vector<18x18x4xbf16> to vector<16x16x4xbf16>
    %35 = vector.extract_strided_slice %22 {offsets = [2, 1, 0], sizes = [16, 16, 4], strides = [1, 1, 1]} : vector<18x18x4xbf16> to vector<16x16x4xbf16>
    %36 = tpu.concatenate %33, %34, %35 in 2 : vector<16x16x4xbf16>, vector<16x16x4xbf16>, vector<16x16x4xbf16> -> vector<16x16x12xbf16>
    %37 = vector.shape_cast %36 : vector<16x16x12xbf16> to vector<256x12xbf16>
    %cst_17 = arith.constant 0.000000e+00 : bf16
    %38 = vector.broadcast %cst_17 : bf16 to vector<256x116xbf16>
    %39 = tpu.concatenate %37, %38 in 1 : vector<256x12xbf16>, vector<256x116xbf16> -> vector<256x128xbf16>
    %c1 = arith.constant 1 : index
    %c0_18 = arith.constant 0 : index
    %c0_19 = arith.constant 0 : index
    %40 = vector.load %arg7[%c1, %c0_18, %c0_19] : memref<3x128x128xbf16, #tpu.memory_space<vmem>>, vector<1x128x128xbf16>
    %41 = vector.shape_cast %40 : vector<1x128x128xbf16> to vector<128x128xbf16>
    %cst_20 = arith.constant dense<0.000000e+00> : vector<256x128xf32>
    %42 = tpu.matmul %39, %41, %cst_20 {dimension_numbers = #tpu.dot_dimension_numbers<[1], [0], [0], [1], [0, 0, 1, 1], [], []>} : vector<256x128xbf16>, vector<128x128xbf16>, vector<256x128xf32> -> vector<256x128xf32>
    %43 = arith.addf %32, %42 : vector<256x128xf32>
    %44 = vector.extract_strided_slice %22 {offsets = [0, 2, 0], sizes = [16, 16, 4], strides = [1, 1, 1]} : vector<18x18x4xbf16> to vector<16x16x4xbf16>
    %45 = vector.extract_strided_slice %22 {offsets = [1, 2, 0], sizes = [16, 16, 4], strides = [1, 1, 1]} : vector<18x18x4xbf16> to vector<16x16x4xbf16>
    %46 = vector.extract_strided_slice %22 {offsets = [2, 2, 0], sizes = [16, 16, 4], strides = [1, 1, 1]} : vector<18x18x4xbf16> to vector<16x16x4xbf16>
    %47 = tpu.concatenate %44, %45, %46 in 2 : vector<16x16x4xbf16>, vector<16x16x4xbf16>, vector<16x16x4xbf16> -> vector<16x16x12xbf16>
    %48 = vector.shape_cast %47 : vector<16x16x12xbf16> to vector<256x12xbf16>
    %cst_21 = arith.constant 0.000000e+00 : bf16
    %49 = vector.broadcast %cst_21 : bf16 to vector<256x116xbf16>
    %50 = tpu.concatenate %48, %49 in 1 : vector<256x12xbf16>, vector<256x116xbf16> -> vector<256x128xbf16>
    %c2 = arith.constant 2 : index
    %c0_22 = arith.constant 0 : index
    %c0_23 = arith.constant 0 : index
    %51 = vector.load %arg7[%c2, %c0_22, %c0_23] : memref<3x128x128xbf16, #tpu.memory_space<vmem>>, vector<1x128x128xbf16>
    %52 = vector.shape_cast %51 : vector<1x128x128xbf16> to vector<128x128xbf16>
    %cst_24 = arith.constant dense<0.000000e+00> : vector<256x128xf32>
    %53 = tpu.matmul %50, %52, %cst_24 {dimension_numbers = #tpu.dot_dimension_numbers<[1], [0], [0], [1], [0, 0, 1, 1], [], []>} : vector<256x128xbf16>, vector<128x128xbf16>, vector<256x128xf32> -> vector<256x128xf32>
    %54 = arith.addf %43, %53 : vector<256x128xf32>
    %cst_25 = arith.constant dense<0.000000e+00> : vector<128xf32>
    %55 = vector.multi_reduction <add>, %54, %cst_25 [0] : vector<256x128xf32> to vector<128xf32>
    %56 = vector.shape_cast %55 : vector<128xf32> to vector<1x128xf32>
    %57 = arith.mulf %54, %54 : vector<256x128xf32>
    %cst_26 = arith.constant dense<0.000000e+00> : vector<128xf32>
    %58 = vector.multi_reduction <add>, %57, %cst_26 [0] : vector<256x128xf32> to vector<128xf32>
    %59 = vector.shape_cast %58 : vector<128xf32> to vector<1x128xf32>
    %60 = tpu.concatenate %56, %59 in 0 : vector<1x128xf32>, vector<1x128xf32> -> vector<2x128xf32>
    %c0_27 = arith.constant 0 : index
    %c0_28 = arith.constant 0 : index
    %c0_29 = arith.constant 0 : index
    %c0_30 = arith.constant 0 : index
    %61 = vector.load %arg9[%c0_27, %c0_28, %c0_29, %c0_30] : memref<1x1x2x128xf32, #tpu.memory_space<vmem>>, vector<1x1x2x128xf32>
    %62 = vector.shape_cast %61 : vector<1x1x2x128xf32> to vector<2x128xf32>
    %63 = vector.shape_cast %60 : vector<2x128xf32> to vector<1x1x2x128xf32>
    tpu.vector_store %arg9[%c0_27, %c0_28, %c0_29, %c0_30], %63 {strides = array<i32>} : memref<1x1x2x128xf32, #tpu.memory_space<vmem>>, vector<1x1x2x128xf32>,
    %64 = vector.shape_cast %54 : vector<256x128xf32> to vector<16x16x128xf32>
    %65 = arith.truncf %64 : vector<16x16x128xf32> to vector<16x16x128xbf16>
    %c0_31 = arith.constant 0 : index
    %c0_32 = arith.constant 0 : index
    %c0_33 = arith.constant 0 : index
    %c0_34 = arith.constant 0 : index
    %66 = vector.load %arg8[%c0_31, %c0_32, %c0_33, %c0_34] : memref<1x16x16x128xbf16, #tpu.memory_space<vmem>>, vector<1x16x16x128xbf16>
    %67 = vector.shape_cast %66 : vector<1x16x16x128xbf16> to vector<16x16x128xbf16>
    %68 = vector.shape_cast %65 : vector<16x16x128xbf16> to vector<1x16x16x128xbf16>
    tpu.vector_store %arg8[%c0_31, %c0_32, %c0_33, %c0_34], %68 {strides = array<i32>} : memref<1x16x16x128xbf16, #tpu.memory_space<vmem>>, vector<1x16x16x128xbf16>,
    return
  }
  func.func @transform_0(%arg0: i32, %arg1: i32) -> (i32, i32, i32, i32) {
    %c0_i32 = arith.constant 0 : i32
    %c0_i32_0 = arith.constant 0 : i32
    %c0_i32_1 = arith.constant 0 : i32
    return %arg0, %arg1, %c0_i32, %c0_i32_0 : i32, i32, i32, i32
  }
  func.func @transform_1(%arg0: i32, %arg1: i32) -> (i32, i32, i32, i32) {
    %c16_i32 = arith.constant 16 : i32
    %0 = arith.muli %arg1, %c16_i32 : i32
    %c1_i32 = arith.constant 1 : i32
    %1 = arith.subi %0, %c1_i32 : i32
    %c0_i32 = arith.constant 0 : i32
    %2 = arith.maxsi %1, %c0_i32 : i32
    %c0_i32_0 = arith.constant 0 : i32
    %c0_i32_1 = arith.constant 0 : i32
    %c0_i32_2 = arith.constant 0 : i32
    return %arg0, %2, %c0_i32_0, %c0_i32_1 : i32, i32, i32, i32
  }
  func.func @transform_2(%arg0: i32, %arg1: i32) -> (i32, i32, i32, i32) {
    %c1_i32 = arith.constant 1 : i32
    %0 = arith.addi %arg1, %c1_i32 : i32
    %c16_i32 = arith.constant 16 : i32
    %1 = arith.muli %0, %c16_i32 : i32
    %c15_i32 = arith.constant 15 : i32
    %2 = arith.minsi %1, %c15_i32 : i32
    %c0_i32 = arith.constant 0 : i32
    %c0_i32_0 = arith.constant 0 : i32
    %c0_i32_1 = arith.constant 0 : i32
    return %arg0, %2, %c0_i32, %c0_i32_0 : i32, i32, i32, i32
  }
  func.func @transform_3(%arg0: i32, %arg1: i32) -> (i32, i32) {
    %c0_i32 = arith.constant 0 : i32
    %c0_i32_0 = arith.constant 0 : i32
    %c0_i32_1 = arith.constant 0 : i32
    return %c0_i32, %c0_i32_0 : i32, i32
  }
  func.func @transform_4(%arg0: i32, %arg1: i32) -> (i32, i32) {
    %c0_i32 = arith.constant 0 : i32
    %c0_i32_0 = arith.constant 0 : i32
    %c0_i32_1 = arith.constant 0 : i32
    return %c0_i32, %c0_i32_0 : i32, i32
  }
  func.func @transform_5(%arg0: i32, %arg1: i32) -> (i32, i32, i32) {
    %c0_i32 = arith.constant 0 : i32
    %c0_i32_0 = arith.constant 0 : i32
    %c0_i32_1 = arith.constant 0 : i32
    %c0_i32_2 = arith.constant 0 : i32
    return %c0_i32, %c0_i32_0, %c0_i32_1 : i32, i32, i32
  }
  func.func @transform_6(%arg0: i32, %arg1: i32) -> (i32, i32, i32, i32) {
    %c0_i32 = arith.constant 0 : i32
    %c0_i32_0 = arith.constant 0 : i32
    %c0_i32_1 = arith.constant 0 : i32
    return %arg0, %arg1, %c0_i32, %c0_i32_0 : i32, i32, i32, i32
  }
  func.func @transform_7(%arg0: i32, %arg1: i32) -> (i32, i32, i32, i32) {
    %c0_i32 = arith.constant 0 : i32
    %c0_i32_0 = arith.constant 0 : i32
    %c0_i32_1 = arith.constant 0 : i32
    return %arg0, %arg1, %c0_i32, %c0_i32_0 : i32, i32, i32, i32
  }
}

</mosaic_0001>

<bundles_post_ra>
// kernel: tpu_custom_call.1
= control target key start
LH: loop header
LB: loop body
LE: loop exit
PB: predicated region body
PF: predicated region fallthrough
CT: control target
= control target key end

     0   :  { %13 = vsyncpa [#allocation3], 0  ;;  %s4367_s0 = inlined_call_operand.vmem [shape: f32[2,16,16,4], index: 0, kind: input, shape index: {}]   ;;  %s4368_s1 = inlined_call_operand.vmem [shape: f32[2,16,16,4], index: 1, kind: input, shape index: {}]   ;;  %s4369_s2 = inlined_call_operand.vmem [shape: f32[2,16,16,4], index: 2, kind: input, shape index: {}]   ;;  %s4370_s3 = inlined_call_operand.vmem [shape: f32[1,4], index: 3, kind: input, shape index: {}]   ;;  %s4371_s4 = inlined_call_operand.vmem [shape: f32[1,4], index: 4, kind: input, shape index: {}]   ;;  %s4372_s5 = inlined_call_operand.vmem [shape: bf16[3,128,128], index: 5, kind: input, shape index: {}]   ;;  %s4373_s6 = inlined_call_operand.hbm [shape: bf16[2,16,16,128], index: 6, kind: output, shape index: {0}]   ;;  %s4374_s7 = inlined_call_operand.hbm [shape: f32[2,1,2,128], index: 7, kind: output, shape index: {1}]  }
   0x1   :  { %15 = vsyncpa [#allocation3 + $0x1], 0 }
   0x2   :  { %16 = vsyncpa [#allocation5], 0 }
   0x3   :  { %18 = vsyncpa [#allocation5 + $0x1], 0  ;;  %s3413_s24 = smov 0   ;;  %s3415_s25 = smov 0  }
   0x4   :  { %s3417_s3 = smov 0   ;;  %s3419_s4 = smov 0  }
   0x5   :  { %s3421_s26 = smov 0   ;;  %s3423_s27 = smov 0  }
   0x6 LB: > { %s2584_s28 = sadd.s32 4294967295, %s3366_s27   ;;  %s2585_s29 = sadd.s32 4294967294, %s3366_s27   ;;  %s3366_s27 = sphi %s3423_s27, %s24_s27   ;;  %s3362_s26 = sphi %s3421_s26, %s4383_s26   ;;  %s3358_s4 = sphi %s3419_s4, %s4382_s4   ;;  %s3354_s3 = sphi %s3417_s3, %s4381_s3   ;;  %s3350_s25 = sphi %s3415_s25, %s4380_s25   ;;  %s3346_s24 = sphi %s3413_s24, %s4379_s24  }
   0x7   : > { %s36_s30 = sadd.s32 1, %s3362_s26  ;;  %s208_s8 = sadd.s32 1, %s3354_s3 }
   0x8   : > { %p38_p0 = scmp.ge.s32.totalorder %s36_s30, 2  ;;  %p218_p1 = scmp.ne.s32.totalorder %s3354_s3, %s3350_s25 }
   0x9   : > { %p219_p2 = scmp.eq.s32.totalorder %s2584_s28, 1  ;;  %p224_p3 = scmp.ne.s32.totalorder %s3350_s25, %s3346_s24 }
   0xa   : > { %s4385_s30 = smov (%p38_p0, %s36_s30), 0  ;;  %p225_p5 = scmp.eq.s32.totalorder %s2585_s29, 1 }
   0xb   : > { %p3453_p4 = por %p219_p2, %p218_p1  ;;  %s203_s10 = ssub.s32 %s3362_s26, %s4385_s30 }
   0xc   : > { %p2588_p6 = scmp.ge.s32.totalorder %s3366_s27, 1  ;;  %p206_p7 = scmp.eq.s32.totalorder %s203_s10, 0 }
   0xd   : > { %p3460_p8 = por %p225_p5, %p224_p3  ;;  %p334_p9 = scmp.lt.s32.totalorder %s3366_s27, 3 }
   0xe   : > { %s3466_s12 = scalar_select %p206_p7, %s3354_s3, %s208_s8  }
   0xf   : > { %p335_p10 = pnand %p2588_p6, %p334_p9 }
  0x10   : > { %p403_p11 = scmp.lt.s32.totalorder (!%p335_p10), %s3358_s4, 1  ;;  %v3472_v0 = vld [vmem:[%s4372_s5] sm:$0xff] (!%p335_p10)   ;;  %v3479_v1 = vld [vmem:[%s4372_s5 + $0x8] sm:$0xff] (!%p335_p10)   ;;  %v3491_v3 = vld [vmem:[%s4372_s5 + $0x10] sm:$0xff] (!%p335_p10)   ;;  %vm678_vm0 = vcmask (!%p335_p10), 1040384   ;;  %s3368_s13 = smov (!%p335_p10), 4  }
  0x11   : > { %338 = sbr.rel (%p335_p10) target bundleno = 578 (0x242), region = 44  ;;  %2993 = vmatprep.subr.bf16.mxu0 (!%p335_p10), %v3472_v0  ;;  %v3234_v2 = vld [vmem:[%s4372_s5 + $0x40] sm:$0xff] (!%p335_p10)   ;;  %v3236_v4 = vld [vmem:[%s4372_s5 + $0x48] sm:$0xff] (!%p335_p10)   ;;  %vm679_vm1 = vsmask.f32 (!%p335_p10), 256  ;;  %v3544_v43 = vld [vmem:[%s4372_s5 + $0x18] sm:$0xff] (!%p335_p10)  }
  0x12   : > { %2994 = vmatpush3.bf16.msra.mxu0 (!%p335_p10), %v3472_v0  ;;  %2945 = vmatprep.subr.bf16.mxu1 (!%p335_p10), %v3234_v2  ;;  %vm3516_vm2 = vmand (!%p335_p10), %vm678_vm0, %vm679_vm1  ;;  %v3238_v45 = vld [vmem:[%s4372_s5 + $0x50] sm:$0xff] (!%p335_p10)   ;;  %s3369_s18 = smov (!%p335_p10), 8   ;;  %v3570_v55 = vld [vmem:[%s4372_s5 + $0x20] sm:$0xff] (!%p335_p10)   ;;  %vm798_vm3 = vcmask (!%p335_p10), 31744   ;;  %vm847_vm4 = vcmask (!%p335_p10), 64512   ;;  %vm880_vm5 = vcmask (!%p335_p10), 97280  }
  0x13   : > { %2995 = vmatprep.subr.bf16.mxu0 (!%p335_p10), %v3479_v1  ;;  %2946 = vmatpush3.bf16.msra.mxu1 (!%p335_p10), %v3234_v2  ;;  %v3240_v62 = vld [vmem:[%s4372_s5 + $0x58] sm:$0xff] (!%p335_p10)   ;;  %vm1767_vm6 = vcmask (!%p335_p10), 1046528   ;;  %vm1091_vm7 = vsmask.f32 (!%p335_p10), 7424  ;;  %s3370_s17 = smov (!%p335_p10), [#allocation2]  }
  0x14   : > { %2947 = vmatprep.subr.bf16.mxu1 (!%p335_p10), %v3236_v4 }
  0x16   : > { %2996 = vmatpush3.bf16.msra.mxu0 (!%p335_p10), %v3479_v1 }
  0x17   : > { %2997 = vmatprep.subr.bf16.mxu0 (!%p335_p10), %v3491_v3  ;;  %2948 = vmatpush3.bf16.msra.mxu1 (!%p335_p10), %v3236_v4 }
  0x18   : > { %s404_s15 = scalar_select %p403_p11, %s3358_s4, 1  ;;  %2949 = vmatprep.subr.bf16.mxu1 %v3238_v45 }
  0x1a   : > { %s3485_s20 = sshll.u32 %s404_s15, 8  ;;  %2998 = vmatpush3.bf16.msra.mxu0 %v3491_v3 }
  0x1b   : > { %s3497_s29 = scalar_lea.vmem %s4367_s0, %s3485_s20  ;;  %2999 = vmatprep.subr.bf16.mxu0 %v3544_v43  ;;  %2950 = vmatpush3.bf16.msra.mxu1 %v3238_v45  ;;  %s2743_s28 = sadd.s32 240, %s3485_s20 }
  0x1c   : > { %v470_v5 = vld [vmem:[%s3497_s29 + $0x10] sm:$0xff]  ;;  %v471_v6 = vld [vmem:[%s3497_s29 + $0x18] sm:$0xff]  ;;  %v468_v7 = vld [vmem:[%s3497_s29] sm:$0xff]  ;;  %s425_s14 = scalar_lea.vmem %s4368_s1, %s3485_s20  ;;  %2951 = vmatprep.subr.bf16.mxu1 %v3240_v62  ;;  %s3629_s19 = scalar_lea.vmem %s4369_s2, %s2743_s28 }
  0x1d   : > { %v501_v8 = vpack.c.bf16 %v471_v6, %v470_v5  ;;  %v469_v9 = vld [vmem:[%s3497_s29 + $0x8] sm:$0xff]  ;;  %v472_v10 = vld [vmem:[%s3497_s29 + $0x20] sm:$0xff]  ;;  %v474_v14 = vld [vmem:[%s3497_s29 + $0x30] sm:$0xff]  ;;  %s2776_s28 = sshll.u32 %s3358_s4, 11 }
  0x1e   : > { %v473_v11 = vld [vmem:[%s3497_s29 + $0x28] sm:$0xff]  ;;  %v500_v12 = vpack.c.bf16 %v469_v9, %v468_v7  ;;  %v475_v15 = vld [vmem:[%s3497_s29 + $0x38] sm:$0xff]  ;;  %v476_v16 = vld [vmem:[%s3497_s29 + $0x40] sm:$0xff]  ;;  %3000 = vmatpush3.bf16.msra.mxu0 %v3544_v43  ;;  %s4282_s15 = scalar_lea.hbm %s4373_s6, %s2776_s28 }
  0x1f   : > { %v502_v13 = vpack.c.bf16 %v473_v11, %v472_v10  ;;  %v531_v17 = vshrl.u32 %v501_v8, 16  ;;  %v503_v18 = vpack.c.bf16 %v475_v15, %v474_v14  ;;  %v477_v19 = vld [vmem:[%s3497_s29 + $0x48] sm:$0xff]  ;;  %v534_v23 = vshll.u32 %v501_v8, 16  ;;  %v478_v34 = vld [vmem:[%s3497_s29 + $0x50] sm:$0xff]  ;;  %v479_v35 = vld [vmem:[%s3497_s29 + $0x58] sm:$0xff]  ;;  %3001 = vmatprep.subr.bf16.mxu0 %v3570_v55  ;;  %2952 = vmatpush3.bf16.msra.mxu1 %v3240_v62 }
  0x20   : > { %v524_v21 = vshrl.u32 %v500_v12, 16  ;;  %v504_v26 = vpack.c.bf16 %v477_v19, %v476_v16  ;;  %v527_v29 = vshll.u32 %v500_v12, 16  ;;  %v488_v41 = vld [vmem:[%s3497_s29 + $0xa0] sm:$0xff]  ;;  %v489_v42 = vld [vmem:[%s3497_s29 + $0xa8] sm:$0xff]  ;;  %v3546_v44 = vpack.c.bf16 %v479_v35, %v478_v34  ;;  %v490_v57 = vld [vmem:[%s3497_s29 + $0xb0] sm:$0xff] }
  0x21   : > { %v538_v22 = vshrl.u32 %v502_v13, 16  ;;  %v533_v24 = vrot.slane %v531_v17, 7  ;;  %v545_v25 = vshrl.u32 %v503_v18, 16  ;;  %v541_v33 = vshll.u32 %v502_v13, 16  ;;  %v480_v48 = vld [vmem:[%s3497_s29 + $0x60] sm:$0xff]  ;;  %v481_v49 = vld [vmem:[%s3497_s29 + $0x68] sm:$0xff] }
  0x22   : > { %v526_v27 = vrot.slane %v524_v21, 7  ;;  %v548_v38 = vshll.u32 %v503_v18, 16  ;;  %v552_v39 = vshrl.u32 %v504_v26, 16  ;;  %v555_v52 = vshll.u32 %v504_v26, 16  ;;  %v491_v60 = vld [vmem:[%s3497_s29 + $0xb8] sm:$0xff]  ;;  %v492_v61 = vld [vmem:[%s3497_s29 + $0xc0] sm:$0xff]  ;;  %3002 = vmatpush3.bf16.msra.mxu0 %v3570_v55 }
  0x23   : > { %v540_v28 = vrot.slane %v538_v22, 7  ;;  %v3523_v30 = vsel %vm3516_vm2, %v533_v24, 0  ;;  %v536_v32 = vor.u32 %v534_v23, %v533_v24  ;;  %v547_v37 = vrot.slane %v545_v25, 7  ;;  %v493_v6 = vld [vmem:[%s3497_s29 + $0xc8] sm:$0xff]  ;;  %v494_v10 = vld [vmem:[%s3497_s29 + $0xd0] sm:$0xff]  ;;  %v495_v11 = vld [vmem:[%s3497_s29 + $0xd8] sm:$0xff] }
  0x24   : > { %948 = vrot.lane.b32.xlu1 %v3523_v30, %s3368_s13  ;;  %v3529_v31 = vsel %vm3516_vm2, %v526_v27, 0  ;;  %v529_v40 = vor.u32 %v527_v29, %v526_v27  ;;  %v554_v51 = vrot.slane %v552_v39, 7  ;;  %v510_v53 = vpack.c.bf16 %v489_v42, %v488_v41  ;;  %v496_v12 = vld [vmem:[%s3497_s29 + $0xe0] sm:$0xff]  ;;  %v497_v13 = vld [vmem:[%s3497_s29 + $0xe8] sm:$0xff]  ;;  %v498_v14 = vld [vmem:[%s3497_s29 + $0xf0] sm:$0xff] }
  0x25   : > { %946 = vrot.lane.b32.xlu0 %v3529_v31, %s3368_s13  ;;  %v3537_v36 = vsel %vm3516_vm2, %v540_v28, 0  ;;  %v3555_v46 = vsel %vm3516_vm2, 0, %v536_v32  ;;  %v543_v47 = vor.u32 %v541_v33, %v540_v28  ;;  %v550_v50 = vor.u32 %v548_v38, %v547_v37  ;;  %v499_v17 = vld [vmem:[%s3497_s29 + $0xf8] sm:$0xff]  ;;  %v3621_v18 = vld [vmem:[%s4372_s5 + $0x28] sm:$0xff]   ;;  %v449_v23 = vld [vmem:[%s425_s14] sm:$0xff] }
  0x26   : > { %v3565_v54 = vsel %vm3516_vm2, 0, %v529_v40  ;;  %v559_v56 = vshrl.u32 %v3546_v44, 16  ;;  %v3580_v59 = vpack.c.bf16 %v481_v49, %v480_v48  ;;  %v557_v2 = vor.u32 %v555_v52, %v554_v51  ;;  %v450_v27 = vld [vmem:[%s425_s14 + $0x8] sm:$0xff]  ;;  %3003 = vmatprep.subr.bf16.mxu0 %v3621_v18  ;;  %v3242_v28 = vld [vmem:[%s4372_s5 + $0x60] sm:$0xff]   ;;  %v3654_v41 = vld [vmem:[%s4372_s5 + $0x30] sm:$0xff]  }
  0x27   : > { %v3578_v58 = vsel %vm3516_vm2, 0, %v543_v47  ;;  %v3593_v63 = vsel %vm3516_vm2, 0, %v550_v50  ;;  %v3597_v4 = vsel %vm3516_vm2, %v547_v37, 0  ;;  %v594_v5 = vshrl.u32 %v510_v53, 16  ;;  %3004 = vmatpush3.bf16.msra.mxu0 %v3621_v18  ;;  %v458_v40 = vld [vmem:[%s3629_s19] sm:$0xff]  ;;  %2953 = vmatprep.subr.bf16.mxu1 %v3242_v28 }
  0x28   : > { %981 = vrot.lane.b32.xlu1 %v3537_v36, %s3369_s18  ;;  %v3607_v7 = vsel %vm3516_vm2, %v554_v51, 0  ;;  %v562_v8 = vshll.u32 %v3546_v44, 16  ;;  %v597_v9 = vshll.u32 %v510_v53, 16  ;;  %v3615_v15 = vrot.slane %v559_v56, 7  ;;  %2954 = vmatpush3.bf16.msra.mxu1 %v3242_v28  ;;  %v459_v53 = vld [vmem:[%s3629_s19 + $0x8] sm:$0xff]  ;;  %v484_v44 = vld [vmem:[%s3497_s29 + $0x80] sm:$0xff] }
  0x29   : > { %979 = vrot.lane.b32.xlu0 %v3523_v30, %s3369_s18  ;;  %v596_v16 = vrot.slane %v594_v5, 7  ;;  %v566_v19 = vshrl.u32 %v3580_v59, 16  ;;  %v511_v21 = vpack.c.bf16 %v491_v60, %v490_v57  ;;  %v512_v22 = vpack.c.bf16 %v493_v6, %v492_v61  ;;  %3005 = vmatprep.subr.bf16.mxu0 %v3654_v41  ;;  %v3244_v56 = vld [vmem:[%s4372_s5 + $0x68] sm:$0xff]   ;;  %v3668_v57 = vld [vmem:[%s4372_s5 + $0x38] sm:$0xff]   ;;  %s3260_s19 = sshll.u32 %s3370_s17, 4  ;;  %s3261_s19 = int_to_ptr.vmem [resolvable:$false] %s3260_s19 }
  0x2a   : > { %v3635_v24 = vsel %vm3516_vm2, 0, %v557_v2  ;;  %v513_v37 = vpack.c.bf16 %v495_v11, %v494_v10  ;;  %v514_v38 = vpack.c.bf16 %v497_v13, %v496_v12  ;;  %v515_v39 = vpack.c.bf16 %v499_v17, %v498_v14  ;;  %2955 = vmatprep.subr.bf16.mxu1 %v3244_v56  ;;  %s3262_s21 = scalar_lea.vmem %s3261_s19, 4096 }
  0x2b   : > { %v599_v25 = vor.u32 %v597_v9, %v596_v16  ;;  %v3639_v26 = vsel %vm3516_vm2, %v596_v16, 0  ;;  %v601_v29 = vshrl.u32 %v511_v21, 16  ;;  %v604_v32 = vshll.u32 %v511_v21, 16  ;;  %3006 = vmatpush3.bf16.msra.mxu0 %v3654_v41  ;;  %v3246_v16 = vld [vmem:[%s4372_s5 + $0x70] sm:$0xff]  }
  0x2c   : > { %766 = vrot.lane.b32.xlu1 %v3555_v46, %s3369_s18  ;;  %v608_v33 = vshrl.u32 %v512_v22, 16  ;;  %v611_v34 = vshll.u32 %v512_v22, 16  ;;  %v455_v47 = vmul.f32 0.0, %v449_v23  ;;  %v456_v48 = vmul.f32 0.0, %v450_v27  ;;  %3007 = vmatprep.subr.bf16.mxu0 %v3668_v57 }
  0x2d   : > { %733 = vrot.lane.b32.xlu0 %v3565_v54, %s3368_s13  ;;  %v3648_v35 = vsel %vm3516_vm2, 0, %v599_v25  ;;  %v603_v42 = vrot.slane %v601_v29, 7  ;;  %v615_v49 = vshrl.u32 %v513_v37, 16  ;;  %v618_v50 = vshll.u32 %v513_v37, 16  ;;  %2956 = vmatpush3.bf16.msra.mxu1 %v3244_v56 }
  0x2e   : > { %v610_v45 = vrot.slane %v608_v33, 7  ;;  %v622_v51 = vshrl.u32 %v514_v38, 16  ;;  %v625_v52 = vshll.u32 %v514_v38, 16  ;;  %v629_v9 = vshrl.u32 %v515_v39, 16  ;;  %2957 = vmatprep.subr.bf16.mxu1 %v3246_v16  ;;  %v3711_v33 = vld [vmem:[%s4372_s5 + $0x80] sm:$0xff]  }
  0x2f   : > { %v606_v60 = vor.u32 %v604_v32, %v603_v42  ;;  %v3672_v62 = vsel %vm3516_vm2, %v603_v42, 0  ;;  %v617_v5 = vrot.slane %v615_v49, 7  ;;  %v632_v10 = vshll.u32 %v515_v39, 16  ;;  %3008 = vmatpush3.bf16.msra.mxu0 %v3668_v57  ;;  %v3247_v32 = vld [vmem:[%s4372_s5 + $0x78] sm:$0xff]  }
  0x30   : > { %768 = vrot.lane.b32.xlu1 %v3578_v58, %s3369_s18  ;;  %v613_v61 = vor.u32 %v611_v34, %v610_v45  ;;  %v3676_v2 = vsel %vm3516_vm2, %v610_v45, 0  ;;  %v624_v6 = vrot.slane %v622_v51, 7  ;;  %v457_v13 = vpack.c.bf16 %v456_v48, %v455_v47  ;;  %v483_v42 = vld [vmem:[%s3497_s29 + $0x78] sm:$0xff]  ;;  %3041 = vmatprep.subr.bf16.mxu0 %v3711_v33 }
  0x31   : > { %735 = vrot.lane.b32.xlu0 %v3555_v46, %s3368_s13  ;;  %v3684_v11 = vsel %vm3516_vm2, 0, %v606_v60  ;;  %v465_v14 = vmul.f32 0.0, %v458_v40  ;;  %v620_v17 = vor.u32 %v618_v50, %v617_v5  ;;  %v3697_v22 = vsel %vm3516_vm2, %v617_v5, 0  ;;  %v482_v40 = vld [vmem:[%s3497_s29 + $0x70] sm:$0xff]  ;;  %2958 = vmatpush3.bf16.msra.mxu1 %v3246_v16 }
  0x32   : > { %v3688_v12 = vsel %vm3516_vm2, 0, %v613_v61  ;;  %v627_v21 = vor.u32 %v625_v52, %v624_v6  ;;  %v3701_v23 = vsel %vm3516_vm2, %v624_v6, 0  ;;  %v569_v25 = vshll.u32 %v3580_v59, 16  ;;  %2959 = vmatprep.subr.bf16.mxu1 %v3247_v32  ;;  %v485_v6 = vld [vmem:[%s3497_s29 + $0x88] sm:$0xff] }
  0x33   : > { %v631_v27 = vrot.slane %v629_v9, 7  ;;  %v517_v28 = vshrl.u32 %v457_v13, 16  ;;  %v466_v29 = vmul.f32 0.0, %v459_v53  ;;  %v568_v34 = vrot.slane %v566_v19, 7 }
  0x34   : > { %739 = vrot.lane.b32.xlu1 %v3593_v63, %s3368_s13  ;;  %v3717_v37 = vsel %vm3516_vm2, 0, %v620_v17  ;;  %v3721_v38 = vsel %vm3516_vm2, 0, %v627_v21  ;;  %v520_v39 = vshll.u32 %v457_v13, 16  ;;  %v564_v48 = vor.u32 %v562_v8, %v3615_v15 }
  0x35   : > { %737 = vrot.lane.b32.xlu0 %v3578_v58, %s3368_s13  ;;  %v634_v45 = vor.u32 %v632_v10, %v631_v27  ;;  %v3727_v47 = vrot.slane %v517_v28, 7  ;;  %v467_v59 = vpack.c.bf16 %v466_v29, %v465_v14  ;;  %v3731_v19 = vsel %vm3516_vm2, %v631_v27, 0  ;;  %2960 = vmatpush3.bf16.msra.mxu1 %v3247_v32 }
  0x36   : > { %v3758_v56 = vsel %vm3516_vm2, 0, %v564_v48  ;;  %v571_v60 = vor.u32 %v569_v25, %v568_v34  ;;  %v507_v61 = vpack.c.bf16 %v483_v42, %v482_v40  ;;  %3089 = vmatprep.subr.bf16.mxu1 %v3472_v0  ;;  %v508_v17 = vpack.c.bf16 %v485_v6, %v484_v44  ;;  %v486_v42 = vld [vmem:[%s3497_s29 + $0x90] sm:$0xff] }
  0x37   : > { %v3740_v49 = vsel %vm3516_vm2, 0, %v634_v45  ;;  %v699_v50 = vsel %vm3516_vm2, %v3727_v47, 0  ;;  %v636_v51 = vshrl.u32 %v467_v59, 16  ;;  %v639_v52 = vshll.u32 %v467_v59, 16  ;;  %v487_v45 = vld [vmem:[%s3497_s29 + $0x98] sm:$0xff]  ;;  %s4242_s29 = sand.u32 1, %s3350_s25  }
  0x38   : > { %772 = vrot.lane.b32.xlu1 %v3635_v24, %s3369_s18  ;;  %v3747_v53 = vor.u32 %v520_v39, %v3727_v47  ;;  %v3780_v14 = vsel %vm3516_vm2, 0, %v571_v60  ;;  %v573_v16 = vshrl.u32 %v507_v61, 16  ;;  %v3789_v21 = vsel %vm3516_vm2, %v3615_v15, 0  ;;  %s2392_s20 = scalar_lea.sflag [#allocation3], %s4242_s29 }
  0x39   : > { %770 = vrot.lane.b32.xlu0 %v3593_v63, %s3369_s18  ;;  %v3752_v8 = vrot.slane %v636_v51, 7  ;;  %v576_v27 = vshll.u32 %v507_v61, 16  ;;  %v580_v28 = vshrl.u32 %v508_v17, 16  ;;  %v3797_v29 = vsel %vm3516_vm2, %v568_v34, 0 }
  0x3a   : > { %v681_v5 = vsel %vm3516_vm2, 0, %v3747_v53  ;;  %v575_v25 = vrot.slane %v573_v16, 7  ;;  %v583_v40 = vshll.u32 %v508_v17, 16  ;;  %v509_v48 = vpack.c.bf16 %v487_v45, %v486_v42 }
  0x3b   : > { %v3766_v9 = vor.u32 %v639_v52, %v3752_v8  ;;  %v716_v10 = vsel %vm3516_vm2, %v3752_v8, 0  ;;  %v582_v39 = vrot.slane %v580_v28, 7 }
  0x3c   : > { %952 = vrot.lane.b32.xlu1 %v3597_v4, %s3368_s13  ;;  %v578_v32 = vor.u32 %v576_v27, %v575_v25  ;;  %v587_v51 = vshrl.u32 %v509_v48, 16  ;;  %v3823_v52 = vsel %vm3516_vm2, %v575_v25, 0  ;;  %v590_v60 = vshll.u32 %v509_v48, 16 }
  0x3d   : > { %950 = vrot.lane.b32.xlu0 %v3537_v36, %s3368_s13  ;;  %v698_v13 = vsel %vm3516_vm2, 0, %v3766_v9  ;;  %v585_v59 = vor.u32 %v583_v40, %v582_v39  ;;  %v3831_v61 = vsel %vm3516_vm2, %v582_v39, 0 }
  0x3e   : > { %v3807_v15 = vsel %vm3516_vm2, 0, %v578_v32  ;;  %v589_v44 = vrot.slane %v587_v51, 7 }
  0x3f   : > { %v3815_v34 = vsel %vm3516_vm2, 0, %v585_v59 }
  0x40   : > { %985 = vrot.lane.b32.xlu1 %v3607_v7, %s3369_s18  ;;  %v592_v6 = vor.u32 %v590_v60, %v589_v44  ;;  %v3851_v17 = vsel %vm3516_vm2, %v589_v44, 0 }
  0x41   : > { %983 = vrot.lane.b32.xlu0 %v3597_v4, %s3369_s18 }
  0x42   : > { %v3839_v16 = vsel %vm3516_vm2, 0, %v592_v6 }
  0x44   : > { %743 = vrot.lane.b32.xlu1 %v3758_v56, %s3368_s13 }
  0x45   : > { %741 = vrot.lane.b32.xlu0 %v3635_v24, %s3368_s13 }
  0x48   : > { %776 = vrot.lane.b32.xlu1 %v3780_v14, %s3369_s18 }
  0x49   : > { %774 = vrot.lane.b32.xlu0 %v3758_v56, %s3369_s18 }
  0x4c   : > { %956 = vrot.lane.b32.xlu1 %v3789_v21, %s3368_s13 }
  0x4d   : > { %954 = vrot.lane.b32.xlu0 %v3607_v7, %s3368_s13 }
  0x50   : > { %989 = vrot.lane.b32.xlu1 %v3797_v29, %s3369_s18 }
  0x51   : > { %987 = vrot.lane.b32.xlu0 %v3789_v21, %s3369_s18 }
  0x54   : > { %747 = vrot.lane.b32.xlu1 %v3807_v15, %s3368_s13 }
  0x55   : > { %745 = vrot.lane.b32.xlu0 %v3780_v14, %s3368_s13 }
  0x58   : > { %780 = vrot.lane.b32.xlu1 %v3815_v34, %s3369_s18 }
  0x59   : > { %778 = vrot.lane.b32.xlu0 %v3807_v15, %s3369_s18 }
  0x5c   : > { %960 = vrot.lane.b32.xlu1 %v3823_v52, %s3368_s13 }
  0x5d   : > { %958 = vrot.lane.b32.xlu0 %v3797_v29, %s3368_s13 }
  0x60   : > { %993 = vrot.lane.b32.xlu1 %v3831_v61, %s3369_s18 }
  0x61   : > { %991 = vrot.lane.b32.xlu0 %v3823_v52, %s3369_s18 }
  0x64   : > { %751 = vrot.lane.b32.xlu1 %v3839_v16, %s3368_s13 }
  0x65   : > { %749 = vrot.lane.b32.xlu0 %v3815_v34, %s3368_s13 }
  0x68   : > { %784 = vrot.lane.b32.xlu1 %v3648_v35, %s3369_s18 }
  0x69   : > { %782 = vrot.lane.b32.xlu0 %v3839_v16, %s3369_s18 }
  0x6c   : > { %964 = vrot.lane.b32.xlu1 %v3851_v17, %s3368_s13 }
  0x6d   : > { %962 = vrot.lane.b32.xlu0 %v3831_v61, %s3368_s13 }
  0x70   : > { %997 = vrot.lane.b32.xlu1 %v3639_v26, %s3369_s18 }
  0x71   : > { %995 = vrot.lane.b32.xlu0 %v3851_v17, %s3369_s18 }
  0x74   : > { %755 = vrot.lane.b32.xlu1 %v3684_v11, %s3368_s13 }
  0x75   : > { %753 = vrot.lane.b32.xlu0 %v3648_v35, %s3368_s13 }
  0x78   : > { %788 = vrot.lane.b32.xlu1 %v3688_v12, %s3369_s18 }
  0x79   : > { %786 = vrot.lane.b32.xlu0 %v3684_v11, %s3369_s18 }
  0x7c   : > { %968 = vrot.lane.b32.xlu1 %v3672_v62, %s3368_s13 }
  0x7d   : > { %966 = vrot.lane.b32.xlu0 %v3639_v26, %s3368_s13 }
  0x80   : > { %1001 = vrot.lane.b32.xlu1 %v3676_v2, %s3369_s18 }
  0x81   : > { %999 = vrot.lane.b32.xlu0 %v3672_v62, %s3369_s18 }
  0x84   : > { %759 = vrot.lane.b32.xlu1 %v3717_v37, %s3368_s13 }
  0x85   : > { %757 = vrot.lane.b32.xlu0 %v3688_v12, %s3368_s13 }
  0x88   : > { %792 = vrot.lane.b32.xlu1 %v3721_v38, %s3369_s18 }
  0x89   : > { %790 = vrot.lane.b32.xlu0 %v3717_v37, %s3369_s18 }
  0x8c   : > { %972 = vrot.lane.b32.xlu1 %v3697_v22, %s3368_s13 }
  0x8d   : > { %970 = vrot.lane.b32.xlu0 %v3676_v2, %s3368_s13 }
  0x90   : > { %1005 = vrot.lane.b32.xlu1 %v3701_v23, %s3369_s18 }
  0x91   : > { %1003 = vrot.lane.b32.xlu0 %v3697_v22, %s3369_s18 }
  0x94   : > { %763 = vrot.lane.b32.xlu1 %v3740_v49, %s3368_s13 }
  0x95   : > { %761 = vrot.lane.b32.xlu0 %v3721_v38, %s3368_s13 }
  0x96   : > { %v949_v25 = vpop.permute.xlu1 %948 }
  0x97   : > { %v947_v27 = vpop.permute.xlu0 %946  ;;  %v1016_v47 = vsel %vm798_vm3, %v3529_v31, %v949_v25 }
  0x98   : > { %796 = vrot.lane.b32.xlu1 %v698_v13, %s3369_s18  ;;  %v1013_v9 = vsel %vm798_vm3, %v699_v50, %v947_v27 }
  0x99   : > { %794 = vrot.lane.b32.xlu0 %v3740_v49, %s3369_s18 }
  0x9a   : > { %v982_v28 = vpop.permute.xlu1 %981 }
  0x9b   : > { %v980_v32 = vpop.permute.xlu0 %979  ;;  %v3931_v20 = vsel %vm847_vm4, %v1016_v47, %v982_v28 }
  0x9c   : > { %976 = vrot.lane.b32.xlu1 %v3731_v19, %s3368_s13  ;;  %v1060_v39 = vsel %vm847_vm4, %v1013_v9, %v980_v32  ;;  %v1108_v27 = vshll.u32 %v3931_v20, 16 }
  0x9d   : > { %974 = vrot.lane.b32.xlu0 %v3701_v23, %s3368_s13  ;;  %v1098_v42 = vshll.u32 %v1060_v39, 16  ;;  %v1769_v45 = vrot.slane %v1060_v39, 1  ;;  %v3250_v39 = vld [vmem:[%s4372_s5 + $0x90] sm:$0xff]  }
  0x9e   : > { %v767_v13 = vpop.permute.xlu1 %766 }
  0x9f   : > { %v734_v49 = vpop.permute.xlu0 %733  ;;  %v1100_v60 = vrot.slane %v1098_v42, 1 }
  0xa0   : > { %v801_v40 = vsel %vm798_vm3, %v681_v5, %v734_v49  ;;  %1009 = vrot.lane.b32.xlu1 %v716_v10, %s3369_s18 }
  0xa1   : > { %1007 = vrot.lane.b32.xlu0 %v3731_v19, %s3369_s18  ;;  %v849_v50 = vsel %vm847_vm4, %v801_v40, %v767_v13  ;;  %v3249_v19 = vld [vmem:[%s4372_s5 + $0x88] sm:$0xff]   ;;  %s2589_s18 = sshll.u32 %s4242_s29, 7 }
  0xa2   : > { %3009 = vmatprep.mubr.msk.bf16.mxu0 %vm880_vm5, %v849_v50  ;;  %v1768_v53 = vrot.slane %v849_v50, 1  ;;  %v769_v5 = vpop.permute.xlu1 %768  ;;  %v1094_v59 = vshll.u32 %v849_v50, 16  ;;  %v1092_v10 = vshrl.u32 %v849_v50, 16  ;;  %v1110_v50 = vrot.slane %v1108_v27, 1  ;;  %s4247_s23 = scalar_lea.vmem [#allocation2], %s2589_s18 }
  0xa3   : > { %v736_v8 = vpop.permute.xlu0 %735  ;;  %s2413_s8 = sshll.u32 %s4247_s23, 4  ;;  %s4284_s8 = int_to_ptr.vmem [resolvable:$true] %s2413_s8 }
  0xa4   : > { %v804_v31 = vsel %vm798_vm3, %v3565_v54, %v736_v8  ;;  %v1096_v48 = vrot.slane %v1094_v59, 1  ;;  %v3939_v51 = vsel %vm1767_vm6, %v1768_v53, %v1769_v45  ;;  %s3256_s16 = scalar_lea.vmem %s4284_s8, 2048  ;;  %p3263_p1 = scmp.lt.s32.totalorder %s4284_s8, %s3261_s19 }
  0xa5   : > { %v3942_v44 = vsel %vm847_vm4, %v804_v31, %v769_v5  ;;  %v3251_v5 = vld [vmem:[%s4372_s5 + $0x98] sm:$0xff]   ;;  %p3257_p12 = scmp.ne.s32.totalorder %s4284_s8, %s3256_s16  ;;  %p3264_p2 = scmp.lt.s32.totalorder %s3262_s21, %s3256_s16 }
  0xa6   : > { %v1104_v6 = vshll.u32 %v3942_v44, 16  ;;  %3010 = vmatmul.mubr.msk.bf16.vlgmr.msra.gmra.mrb[0].mxu0 %vm880_vm5, %v3942_v44  ;;  %v740_v54 = vpop.permute.xlu1 %739  ;;  %v1097_v25 = vor.u32 %v1096_v48, %v1092_v10  ;;  %v1102_v32 = vshrl.u32 %v3942_v44, 16  ;;  %v3252_v10 = vld [vmem:[%s4372_s5 + $0xa0] sm:$0xff]  }
  0xa7   : > { %v738_v28 = vpop.permute.xlu0 %737  ;;  %3042 = vmatpush3.bf16.msra.mxu0 %v3711_v33  ;;  %v810_v49 = vsel %vm798_vm3, %v3578_v58, %v740_v54  ;;  %p3258_p13 = pnand %p3257_p12, %p3453_p4  ;;  %p3265_p3 = por %p3264_p2, %p3263_p1 }
  0xa8   : > { %v1106_v9 = vrot.slane %v1104_v6, 1  ;;  %v1101_v13 = vsel %vm1091_vm7, %v1097_v25, %v1100_v60  ;;  %3043 = vmatprep.subr.bf16.mxu0 %v3249_v19  ;;  %v807_v33 = vsel %vm798_vm3, %v3555_v46, %v738_v28 }
  0xa9   : > { %2961 = vmatprep.mubr.msk.bf16.mxu1 %vm880_vm5, %v1101_v13  ;;  %p3259_p0 = pneg %p3258_p13 }
  0xaa   : > { %v773_v40 = vpop.permute.xlu1 %772  ;;  %v1107_v47 = vor.u32 %v1106_v9, %v1102_v32 }
  0xab   : > { %v3960_v42 = vsel %vm847_vm4, %v810_v49, %v773_v40  ;;  %v771_v45 = vpop.permute.xlu0 %770  ;;  %3044 = vmatpush3.bf16.msra.mxu0 %v3249_v19  ;;  %p3266_p5 = pnand %p3265_p3, %p3259_p0 }
  0xac   : > { %v3963_v53 = vsel %vm847_vm4, %v807_v33, %v771_v45  ;;  %3045 = vmatprep.subr.bf16.mxu0 %v3250_v39  ;;  %v1111_v58 = vsel %vm1091_vm7, %v1107_v47, %v1110_v50  ;;  %v1124_v46 = vshll.u32 %v3960_v42, 16  ;;  %v1122_v27 = vshrl.u32 %v3960_v42, 16  ;;  %v3254_v33 = vld [vmem:[%s4372_s5 + $0xb0] sm:$0xff]  }
  0xad   : > { %3013 = vmatprep.mubr.msk.bf16.mxu0 %vm880_vm5, %v3963_v53  ;;  %2962 = vmatmul.mubr.msk.bf16.vlgmr.msra.gmra.mrb[0].mxu1 %vm880_vm5, %v1111_v58  ;;  %v1114_v8 = vshll.u32 %v3963_v53, 16 }
  0xae   : > { %3014 = vmatmul.mubr.msk.bf16.gmra.mrb[4].mxu0 %vm880_vm5, %v3960_v42  ;;  %v953_v59 = vpop.permute.xlu1 %952  ;;  %3097 = vmatpush3.bf16.msra.mxu1 %v3472_v0  ;;  %v1126_v48 = vrot.slane %v1124_v46, 1 }
  0xaf   : > { %v951_v31 = vpop.permute.xlu0 %950  ;;  %3046 = vmatpush3.bf16.msra.mxu0 %v3250_v39  ;;  %3090 = vmatprep.subr.bf16.mxu1 %v3479_v1  ;;  %v1022_v19 = vsel %vm798_vm3, %v3537_v36, %v953_v59  ;;  %v1116_v6 = vrot.slane %v1114_v8, 1  ;;  %v3253_v36 = vld [vmem:[%s4372_s5 + $0xa8] sm:$0xff]  }
  0xb0   : > { %3047 = vmatprep.subr.bf16.mxu0 %v3251_v5  ;;  %v1019_v54 = vsel %vm798_vm3, %v3523_v30, %v951_v31  ;;  %v1112_v30 = vshrl.u32 %v3963_v53, 16  ;;  %v1127_v13 = vor.u32 %v1126_v48, %v1122_v27 }
  0xb2   : > { %v986_v60 = vpop.permute.xlu1 %985  ;;  %3098 = vmatpush3.bf16.msra.mxu1 %v3479_v1  ;;  %v1117_v49 = vor.u32 %v1116_v6, %v1112_v30 }
  0xb3   : > { %v3986_v25 = vsel %vm847_vm4, %v1022_v19, %v986_v60  ;;  %v984_v0 = vpop.permute.xlu0 %983  ;;  %3048 = vmatpush3.bf16.msra.mxu0 %v3251_v5  ;;  %3091 = vmatprep.subr.bf16.mxu1 %v3491_v3 }
  0xb4   : > { %v1128_v28 = vshll.u32 %v3986_v25, 16  ;;  %v3992_v32 = vsel %vm847_vm4, %v1019_v54, %v984_v0  ;;  %3049 = vmatprep.subr.bf16.mxu0 %v3252_v10 }
  0xb5   : > { %v1118_v9 = vshll.u32 %v3992_v32, 16 }
  0xb6   : > { %v1130_v1 = vrot.slane %v1128_v28, 1  ;;  %v744_v39 = vpop.permute.xlu1 %743  ;;  %3099 = vmatpush3.bf16.msra.mxu1 %v3491_v3 }
  0xb7   : > { %v1120_v40 = vrot.slane %v1118_v9, 1  ;;  %v742_v47 = vpop.permute.xlu0 %741  ;;  %3050 = vmatpush3.bf16.msra.mxu0 %v3252_v10  ;;  %3092 = vmatprep.subr.bf16.mxu1 %v3544_v43  ;;  %v816_v5 = vsel %vm798_vm3, %v3635_v24, %v744_v39  ;;  %v3255_v24 = vld [vmem:[%s4372_s5 + $0xb8] sm:$0xff]  }
  0xb8   : > { %v1131_v50 = vsel %vm1091_vm7, %v1127_v13, %v1130_v1  ;;  %3051 = vmatprep.subr.bf16.mxu0 %v3253_v36  ;;  %v813_v3 = vsel %vm798_vm3, %v3593_v63, %v742_v47 }
  0xb9   : > { %v1121_v45 = vsel %vm1091_vm7, %v1117_v49, %v1120_v40 }
  0xba   : > { %2965 = vmatprep.mubr.msk.bf16.mxu1 %vm880_vm5, %v1121_v45  ;;  %v777_v58 = vpop.permute.xlu1 %776  ;;  %3100 = vmatpush3.bf16.msra.mxu1 %v3544_v43 }
  0xbb   : > { %v4013_v46 = vsel %vm847_vm4, %v816_v5, %v777_v58  ;;  %2966 = vmatmul.mubr.msk.bf16.gmra.mrb[4].mxu1 %vm880_vm5, %v1131_v50  ;;  %v775_v59 = vpop.permute.xlu0 %774  ;;  %3052 = vmatpush3.bf16.msra.mxu0 %v3253_v36 }
  0xbc   : > { %v4017_v8 = vsel %vm847_vm4, %v813_v3, %v775_v59  ;;  %3053 = vmatprep.subr.bf16.mxu0 %v3254_v33  ;;  %3093 = vmatprep.subr.bf16.mxu1 %v3570_v55  ;;  %v1144_v63 = vshll.u32 %v4013_v46, 16  ;;  %v1142_v28 = vshrl.u32 %v4013_v46, 16  ;;  %v1771_v59 = vrot.slane %v3942_v44, 1 }
  0xbd   : > { %3017 = vmatprep.mubr.msk.bf16.mxu0 %vm880_vm5, %v4017_v8  ;;  %v1134_v10 = vshll.u32 %v4017_v8, 16 }
  0xbe   : > { %3018 = vmatmul.mubr.msk.bf16.gmra.mrb[8].mxu0 %vm880_vm5, %v4013_v46  ;;  %v957_v31 = vpop.permute.xlu1 %956  ;;  %3101 = vmatpush3.bf16.msra.mxu1 %v3570_v55  ;;  %v1146_v43 = vrot.slane %v1144_v63, 1 }
  0xbf   : > { %v955_v48 = vpop.permute.xlu0 %954  ;;  %3054 = vmatpush3.bf16.msra.mxu0 %v3254_v33  ;;  %3094 = vmatprep.subr.bf16.mxu1 %v3621_v18  ;;  %v1028_v19 = vsel %vm798_vm3, %v3607_v7, %v957_v31  ;;  %v1136_v6 = vrot.slane %v1134_v10, 1  ;;  %v1132_v7 = vshrl.u32 %v4017_v8, 16  ;;  %v1772_v10 = vrot.slane %v3931_v20, 1 }
  0xc0   : > { %3055 = vmatprep.subr.bf16.mxu0 %v3255_v24  ;;  %v1025_v54 = vsel %vm798_vm3, %v3597_v4, %v955_v48  ;;  %v1147_v4 = vor.u32 %v1146_v43, %v1142_v28 }
  0xc1   : > { %v1137_v1 = vor.u32 %v1136_v6, %v1132_v7  ;;  %v1773_v20 = vsel %vm1767_vm6, %v1771_v59, %v1772_v10 }
  0xc2   : > { %v990_v60 = vpop.permute.xlu1 %989  ;;  %3102 = vmatpush3.bf16.msra.mxu1 %v3621_v18 }
  0xc3   : > { %v4037_v0 = vsel %vm847_vm4, %v1028_v19, %v990_v60  ;;  %v988_v27 = vpop.permute.xlu0 %987  ;;  %3056 = vmatpush3.bf16.msra.mxu0 %v3255_v24  ;;  %3095 = vmatprep.subr.bf16.mxu1 %v3654_v41  ;;  %v1775_v24 = vrot.slane %v3992_v32, 1  ;;  %v1774_v60 = vrot.slane %v3963_v53, 1 }
  0xc4   : > { %v1148_v55 = vshll.u32 %v4037_v0, 16  ;;  %v4042_v36 = vsel %vm847_vm4, %v1025_v54, %v988_v27 }
  0xc5   : > { %v1138_v30 = vshll.u32 %v4042_v36, 16 }
  0xc6   : > { %v1150_v9 = vrot.slane %v1148_v55, 1  ;;  %v748_v13 = vpop.permute.xlu1 %747  ;;  %3103 = vmatpush3.bf16.msra.mxu1 %v3654_v41  ;;  %v1776_v55 = vsel %vm1767_vm6, %v1774_v60, %v1775_v24  ;;  %v1783_v24 = vrot.slane %v4013_v46, 1 }
  0xc7   : > { %v1140_v39 = vrot.slane %v1138_v30, 1  ;;  %v746_v49 = vpop.permute.xlu0 %745  ;;  %3096 = vmatprep.subr.bf16.mxu1 %v3668_v57  ;;  %v822_v18 = vsel %vm798_vm3, %v3780_v14, %v748_v13 }
  0xc8   : > { %v1151_v40 = vsel %vm1091_vm7, %v1147_v4, %v1150_v9  ;;  %v819_v33 = vsel %vm798_vm3, %v3758_v56, %v746_v49  ;;  %v1778_v9 = vrot.slane %v3986_v25, 1 }
  0xc9   : > { %v1141_v47 = vsel %vm1091_vm7, %v1137_v1, %v1140_v39  ;;  %v1781_v1 = vrot.slane %v4042_v36, 1 }
  0xca   : > { %2969 = vmatprep.mubr.msk.bf16.mxu1 %vm880_vm5, %v1141_v47  ;;  %v781_v50 = vpop.permute.xlu1 %780  ;;  %3104 = vmatpush3.bf16.msra.mxu1 %v3668_v57 }
  0xcb   : > { %v4058_v45 = vsel %vm847_vm4, %v822_v18, %v781_v50  ;;  %2970 = vmatmul.mubr.msk.bf16.gmra.mrb[8].mxu1 %vm880_vm5, %v1151_v40  ;;  %v779_v5 = vpop.permute.xlu0 %778  ;;  %v1777_v40 = vrot.slane %v3960_v42, 1  ;;  %v1780_v50 = vrot.slane %v4017_v8, 1 }
  0xcc   : > { %v4062_v41 = vsel %vm847_vm4, %v819_v33, %v779_v5  ;;  %v1164_v14 = vshll.u32 %v4058_v45, 16  ;;  %v1162_v44 = vshrl.u32 %v4058_v45, 16 }
  0xcd   : > { %3021 = vmatprep.mubr.msk.bf16.mxu0 %vm880_vm5, %v4062_v41  ;;  %v1154_v58 = vshll.u32 %v4062_v41, 16 }
  0xce   : > { %3022 = vmatmul.mubr.msk.bf16.gmra.mrb[12].mxu0 %vm880_vm5, %v4058_v45  ;;  %v961_v56 = vpop.permute.xlu1 %960  ;;  %v1166_v57 = vrot.slane %v1164_v14, 1 }
  0xcf   : > { %3057 = vmatprep.mubr.msk.bf16.mxu0 %vm880_vm5, %v3939_v51  ;;  %v959_v3 = vpop.permute.xlu0 %958  ;;  %v1034_v63 = vsel %vm798_vm3, %v3797_v29, %v961_v56  ;;  %v1156_v48 = vrot.slane %v1154_v58, 1  ;;  %v1152_v29 = vshrl.u32 %v4062_v41, 16  ;;  %v1784_v56 = vrot.slane %v4037_v0, 1 }
  0xd0   : > { %v1031_v43 = vsel %vm798_vm3, %v3789_v21, %v959_v3  ;;  %v1167_v27 = vor.u32 %v1166_v57, %v1162_v44 }
  0xd1   : > { %v1157_v7 = vor.u32 %v1156_v48, %v1152_v29  ;;  %v1786_v48 = vrot.slane %v4062_v41, 1  ;;  %v1785_v44 = vsel %vm1767_vm6, %v1783_v24, %v1784_v56 }
  0xd2   : > { %v994_v31 = vpop.permute.xlu1 %993 }
  0xd3   : > { %v4081_v19 = vsel %vm847_vm4, %v1034_v63, %v994_v31  ;;  %v992_v51 = vpop.permute.xlu0 %991 }
  0xd4   : > { %v1168_v32 = vshll.u32 %v4081_v19, 16  ;;  %v1072_v6 = vsel %vm847_vm4, %v1031_v43, %v992_v51 }
  0xd5   : > { %v1158_v54 = vshll.u32 %v1072_v6, 16  ;;  %v1787_v8 = vrot.slane %v1072_v6, 1 }
  0xd6   : > { %v1170_v28 = vrot.slane %v1168_v32, 1  ;;  %3058 = vmatmul.mubr.msk.bf16.vlgmr.msra.gmra.mrb[0].mxu0 %vm880_vm5, %v1773_v20  ;;  %v752_v21 = vpop.permute.xlu1 %751 }
  0xd7   : > { %v1160_v53 = vrot.slane %v1158_v54, 1  ;;  %3061 = vmatprep.mubr.msk.bf16.mxu0 %vm880_vm5, %v1776_v55  ;;  %v750_v30 = vpop.permute.xlu0 %749  ;;  %v828_v39 = vsel %vm798_vm3, %v3815_v34, %v752_v21  ;;  %v1779_v34 = vsel %vm1767_vm6, %v1777_v40, %v1778_v9  ;;  %v1788_v6 = vsel %vm1767_vm6, %v1786_v48, %v1787_v8 }
  0xd8   : > { %v1171_v4 = vsel %vm1091_vm7, %v1167_v27, %v1170_v28  ;;  %v825_v47 = vsel %vm798_vm3, %v3807_v15, %v750_v30  ;;  %v1782_v15 = vsel %vm1767_vm6, %v1780_v50, %v1781_v1  ;;  %v1790_v27 = vrot.slane %v4081_v19, 1 }
  0xd9   : > { %v1161_v13 = vsel %vm1091_vm7, %v1157_v7, %v1160_v53  ;;  %v1789_v53 = vrot.slane %v4058_v45, 1 }
  0xda   : > { %2973 = vmatprep.mubr.msk.bf16.mxu1 %vm880_vm5, %v1161_v13  ;;  %v785_v49 = vpop.permute.xlu1 %784 }
  0xdb   : > { %v4103_v18 = vsel %vm847_vm4, %v828_v39, %v785_v49  ;;  %2974 = vmatmul.mubr.msk.bf16.gmra.mrb[12].mxu1 %vm880_vm5, %v1171_v4  ;;  %v783_v25 = vpop.permute.xlu0 %782 }
  0xdc   : > { %v4108_v36 = vsel %vm847_vm4, %v825_v47, %v783_v25  ;;  %v1184_v33 = vshll.u32 %v4103_v18, 16  ;;  %v1182_v43 = vshrl.u32 %v4103_v18, 16  ;;  %v1795_v47 = vrot.slane %v4103_v18, 1 }
  0xdd   : > { %v1174_v5 = vshll.u32 %v4108_v36, 16  ;;  %v1172_v60 = vshrl.u32 %v4108_v36, 16  ;;  %v1792_v9 = vrot.slane %v4108_v36, 1 }
  0xde   : > { %3062 = vmatmul.mubr.msk.bf16.gmra.mrb[4].mxu0 %vm880_vm5, %v1779_v34  ;;  %v965_v42 = vpop.permute.xlu1 %964  ;;  %v1186_v58 = vrot.slane %v1184_v33, 1 }
  0xdf   : > { %3065 = vmatprep.mubr.msk.bf16.mxu0 %vm880_vm5, %v1782_v15  ;;  %v963_v14 = vpop.permute.xlu0 %962  ;;  %v1040_v3 = vsel %vm798_vm3, %v3831_v61, %v965_v42  ;;  %v1176_v57 = vrot.slane %v1174_v5, 1 }
  0xe0   : > { %v1037_v63 = vsel %vm798_vm3, %v3823_v52, %v963_v14  ;;  %v1187_v46 = vor.u32 %v1186_v58, %v1182_v43 }
  0xe1   : > { %v1177_v29 = vor.u32 %v1176_v57, %v1172_v60 }
  0xe2   : > { %v998_v59 = vpop.permute.xlu1 %997 }
  0xe3   : > { %v1078_v31 = vsel %vm847_vm4, %v1040_v3, %v998_v59  ;;  %v996_v10 = vpop.permute.xlu0 %995 }
  0xe4   : > { %v1188_v0 = vshll.u32 %v1078_v31, 16  ;;  %v1076_v51 = vsel %vm847_vm4, %v1037_v63, %v996_v10  ;;  %v1796_v40 = vrot.slane %v1078_v31, 1 }
  0xe5   : > { %v1178_v61 = vshll.u32 %v1076_v51, 16  ;;  %v1793_v21 = vrot.slane %v1076_v51, 1 }
  0xe6   : > { %v1190_v32 = vrot.slane %v1188_v0, 1  ;;  %3066 = vmatmul.mubr.msk.bf16.gmra.mrb[8].mxu0 %vm880_vm5, %v1785_v44  ;;  %v756_v52 = vpop.permute.xlu1 %755  ;;  %v1797_v58 = vsel %vm1767_vm6, %v1795_v47, %v1796_v40 }
  0xe7   : > { %v1180_v54 = vrot.slane %v1178_v61, 1  ;;  %3069 = vmatprep.mubr.msk.bf16.mxu0 %vm880_vm5, %v1788_v6  ;;  %v754_v41 = vpop.permute.xlu0 %753  ;;  %v834_v55 = vsel %vm798_vm3, %v3648_v35, %v756_v52  ;;  %v1791_v35 = vsel %vm1767_vm6, %v1789_v53, %v1790_v27 }
  0xe8   : > { %v1191_v20 = vsel %vm1091_vm7, %v1187_v46, %v1190_v32  ;;  %v831_v30 = vsel %vm798_vm3, %v3839_v16, %v754_v41  ;;  %v1794_v16 = vsel %vm1767_vm6, %v1792_v9, %v1793_v21 }
  0xe9   : > { %v1181_v28 = vsel %vm1091_vm7, %v1177_v29, %v1180_v54 }
  0xea   : > { %2977 = vmatprep.mubr.msk.bf16.mxu1 %vm880_vm5, %v1181_v28  ;;  %v789_v7 = vpop.permute.xlu1 %788 }
  0xeb   : > { %v4141_v4 = vsel %vm847_vm4, %v834_v55, %v789_v7  ;;  %2978 = vmatmul.mubr.msk.bf16.gmra.mrb[16].mxu1 %vm880_vm5, %v1191_v20  ;;  %v787_v19 = vpop.permute.xlu0 %786 }
  0xec   : > { %v4146_v13 = vsel %vm847_vm4, %v831_v30, %v787_v19  ;;  %v1204_v1 = vshll.u32 %v4141_v4, 16  ;;  %v1202_v14 = vshrl.u32 %v4141_v4, 16  ;;  %v1801_v46 = vrot.slane %v4141_v4, 1 }
  0xed   : > { %v1194_v39 = vshll.u32 %v4146_v13, 16  ;;  %v1192_v3 = vshrl.u32 %v4146_v13, 16  ;;  %v1798_v59 = vrot.slane %v4146_v13, 1 }
  0xee   : > { %3070 = vmatmul.mubr.msk.bf16.gmra.mrb[12].mxu0 %vm880_vm5, %v1791_v35  ;;  %v969_v45 = vpop.permute.xlu1 %968  ;;  %v1206_v25 = vrot.slane %v1204_v1, 1 }
  0xef   : > { %3073 = vmatprep.mubr.msk.bf16.mxu0 %vm880_vm5, %v1794_v16  ;;  %v967_v49 = vpop.permute.xlu0 %966  ;;  %v1046_v50 = vsel %vm798_vm3, %v3639_v26, %v969_v45  ;;  %v1196_v33 = vrot.slane %v1194_v39, 1 }
  0xf0   : > { %v1043_v42 = vsel %vm798_vm3, %v3851_v17, %v967_v49  ;;  %v1207_v57 = vor.u32 %v1206_v25, %v1202_v14 }
  0xf1   : > { %v1197_v31 = vor.u32 %v1196_v33, %v1192_v3 }
  0xf2   : > { %v1002_v34 = vpop.permute.xlu1 %1001 }
  0xf3   : > { %v1082_v15 = vsel %vm847_vm4, %v1046_v50, %v1002_v34  ;;  %v1000_v5 = vpop.permute.xlu0 %999 }
  0xf4   : > { %v1208_v56 = vshll.u32 %v1082_v15, 16  ;;  %v1080_v8 = vsel %vm847_vm4, %v1043_v42, %v1000_v5  ;;  %v1802_v51 = vrot.slane %v1082_v15, 1 }
  0xf5   : > { %v1198_v26 = vshll.u32 %v1080_v8, 16  ;;  %v1799_v24 = vrot.slane %v1080_v8, 1 }
  0xf6   : > { %v1210_v63 = vrot.slane %v1208_v56, 1  ;;  %3074 = vmatmul.mubr.msk.bf16.gmra.mrb[16].mxu0 %vm880_vm5, %v1797_v58  ;;  %v760_v17 = vpop.permute.xlu1 %759  ;;  %v1803_v54 = vsel %vm1767_vm6, %v1801_v46, %v1802_v51 }
  0xf7   : > { %v1200_v10 = vrot.slane %v1198_v26, 1  ;;  %v758_v48 = vpop.permute.xlu0 %757  ;;  %v1800_v43 = vsel %vm1767_vm6, %v1798_v59, %v1799_v24  ;;  %v840_v61 = vsel %vm798_vm3, %v3688_v12, %v760_v17 }
  0xf8   : > { %3077 = vmatprep.mubr.msk.bf16.mxu0 %vm880_vm5, %v1800_v43  ;;  %v1211_v0 = vsel %vm1091_vm7, %v1207_v57, %v1210_v63  ;;  %v837_v32 = vsel %vm798_vm3, %v3684_v11, %v758_v48 }
  0xf9   : > { %v1201_v60 = vsel %vm1091_vm7, %v1197_v31, %v1200_v10 }
  0xfa   : > { %2981 = vmatprep.mubr.msk.bf16.mxu1 %vm880_vm5, %v1201_v60  ;;  %v793_v44 = vpop.permute.xlu1 %792 }
  0xfb   : > { %v4177_v52 = vsel %vm847_vm4, %v840_v61, %v793_v44  ;;  %2982 = vmatmul.mubr.msk.bf16.gmra.mrb[20].mxu1 %vm880_vm5, %v1211_v0  ;;  %v791_v6 = vpop.permute.xlu0 %790 }
  0xfc   : > { %v4181_v29 = vsel %vm847_vm4, %v837_v32, %v791_v6  ;;  %v1224_v12 = vshll.u32 %v4177_v52, 16  ;;  %v1222_v55 = vshrl.u32 %v4177_v52, 16  ;;  %v1807_v9 = vrot.slane %v4177_v52, 1 }
  0xfd   : > { %v1214_v20 = vshll.u32 %v4181_v29, 16  ;;  %v1212_v16 = vshrl.u32 %v4181_v29, 16 }
  0xfe   : > { %3078 = vmatmul.mubr.msk.bf16.gmra.mrb[20].mxu0 %vm880_vm5, %v1803_v54  ;;  %v973_v41 = vpop.permute.xlu1 %972  ;;  %v1226_v11 = vrot.slane %v1224_v12, 1 }
  0xff   : > { %v971_v27 = vpop.permute.xlu0 %970  ;;  %v1052_v28 = vsel %vm798_vm3, %v3676_v2, %v973_v41  ;;  %v1216_v7 = vrot.slane %v1214_v20, 1  ;;  %v1804_v2 = vrot.slane %v4181_v29, 1 }
 0x100   : > { %v1049_v53 = vsel %vm798_vm3, %v3672_v62, %v971_v27  ;;  %v1227_v40 = vor.u32 %v1226_v11, %v1222_v55 }
 0x101   : > { %v1217_v50 = vor.u32 %v1216_v7, %v1212_v16 }
 0x102   : > { %v1006_v21 = vpop.permute.xlu1 %1005 }
 0x103   : > { %v1086_v30 = vsel %vm847_vm4, %v1052_v28, %v1006_v21  ;;  %v1004_v19 = vpop.permute.xlu0 %1003 }
 0x104   : > { %v1228_v35 = vshll.u32 %v1086_v30, 16  ;;  %v1808_v1 = vrot.slane %v1086_v30, 1  ;;  %v1084_v45 = vsel %vm847_vm4, %v1049_v53, %v1004_v19 }
 0x105   : > { %v1218_v39 = vshll.u32 %v1084_v45, 16  ;;  %v1805_v49 = vrot.slane %v1084_v45, 1 }
 0x106   : > { %v1230_v47 = vrot.slane %v1228_v35, 1  ;;  %v764_v25 = vpop.permute.xlu1 %763  ;;  %v1809_v62 = vsel %vm1767_vm6, %v1807_v9, %v1808_v1 }
 0x107   : > { %v1220_v34 = vrot.slane %v1218_v39, 1  ;;  %v762_v33 = vpop.permute.xlu0 %761  ;;  %v1806_v42 = vsel %vm1767_vm6, %v1804_v2, %v1805_v49  ;;  %v846_v14 = vsel %vm798_vm3, %v3721_v38, %v764_v25 }
 0x108   : > { %3081 = vmatprep.mubr.msk.bf16.mxu0 %vm880_vm5, %v1806_v42  ;;  %v1231_v15 = vsel %vm1091_vm7, %v1227_v40, %v1230_v47  ;;  %v843_v8 = vsel %vm798_vm3, %v3717_v37, %v762_v33 }
 0x109   : > { %3082 = vmatmul.mubr.msk.bf16.gmra.mrb[24].mxu0 %vm880_vm5, %v1809_v62  ;;  %v1221_v5 = vsel %vm1091_vm7, %v1217_v50, %v1220_v34 }
 0x10a   : > { %2985 = vmatprep.mubr.msk.bf16.mxu1 %vm880_vm5, %v1221_v5  ;;  %v797_v56 = vpop.permute.xlu1 %796 }
 0x10b   : > { %v879_v58 = vsel %vm847_vm4, %v846_v14, %v797_v56  ;;  %2986 = vmatmul.mubr.msk.bf16.gmra.mrb[24].mxu1 %vm880_vm5, %v1231_v15  ;;  %v795_v3 = vpop.permute.xlu0 %794 }
 0x10c   : > { %v877_v59 = vsel %vm847_vm4, %v843_v8, %v795_v3  ;;  %v1244_v26 = vshll.u32 %v879_v58, 16  ;;  %v1242_v10 = vshrl.u32 %v879_v58, 16  ;;  %v1813_v51 = vrot.slane %v879_v58, 1 }
 0x10d   : > { %v1234_v57 = vshll.u32 %v877_v59, 16  ;;  %v1232_v46 = vshrl.u32 %v877_v59, 16  ;;  %v1810_v32 = vrot.slane %v877_v59, 1 }
 0x10e   : > { %v977_v24 = vpop.permute.xlu1 %976  ;;  %v1246_v17 = vrot.slane %v1244_v26, 1 }
 0x10f   : > { %v975_v63 = vpop.permute.xlu0 %974  ;;  %v1058_v38 = vsel %vm798_vm3, %v3701_v23, %v977_v24  ;;  %v1236_v48 = vrot.slane %v1234_v57, 1 }
 0x110   : > { %v1055_v37 = vsel %vm798_vm3, %v3697_v22, %v975_v63  ;;  %v1247_v12 = vor.u32 %v1246_v17, %v1242_v10 }
 0x111   : > { %v1237_v20 = vor.u32 %v1236_v48, %v1232_v46 }
 0x112   : > { %v1010_v31 = vpop.permute.xlu1 %1009 }
 0x113   : > { %v1090_v43 = vsel %vm847_vm4, %v1058_v38, %v1010_v31  ;;  %v1008_v0 = vpop.permute.xlu0 %1007 }
 0x114   : > { %v1248_v60 = vshll.u32 %v1090_v43, 16  ;;  %v1814_v61 = vrot.slane %v1090_v43, 1  ;;  %v1088_v44 = vsel %vm847_vm4, %v1055_v37, %v1008_v0 }
 0x115   : > { %v1238_v6 = vshll.u32 %v1088_v44, 16  ;;  %v1811_v54 = vrot.slane %v1088_v44, 1 }
 0x116   : > { %v1250_v23 = vrot.slane %v1248_v60, 1  ;;  %v1815_v41 = vsel %vm1767_vm6, %v1813_v51, %v1814_v61 }
 0x117   : > { %v1240_v27 = vrot.slane %v1238_v6, 1  ;;  %v1812_v22 = vsel %vm1767_vm6, %v1810_v32, %v1811_v54 }
 0x118   : > { %3085 = vmatprep.mubr.msk.bf16.mxu0 %vm880_vm5, %v1812_v22  ;;  %v1251_v11 = vsel %vm1091_vm7, %v1247_v12, %v1250_v23 }
 0x119   : > { %3086 = vmatmul.mubr.msk.bf16.gmra.mrb[28].mxu0 %vm880_vm5, %v1815_v41  ;;  %v1241_v28 = vsel %vm1091_vm7, %v1237_v20, %v1240_v27 }
 0x11a   : > { %2989 = vmatprep.mubr.msk.bf16.mxu1 %vm880_vm5, %v1241_v28 }
 0x11b   : > { %2990 = vmatmul.mubr.msk.bf16.gmra.mrb[28].mxu1 %vm880_vm5, %v1251_v11 }
 0x11c   : > { %3025 = vmatprep.mubr.msk.bf16.mxu1 %vm880_vm5, %v4108_v36 }
 0x123   : > { %3026 = vmatmul.mubr.msk.bf16.vlgmr.msra.gmra.mrb[16].mxu1 %vm880_vm5, %v4103_v18 }
 0x124   : > { %3029 = vmatprep.mubr.msk.bf16.mxu1 %vm880_vm5, %v4146_v13 }
 0x12b   : > { %3030 = vmatmul.mubr.msk.bf16.gmra.mrb[20].mxu1 %vm880_vm5, %v4141_v4 }
 0x12c   : > { %3033 = vmatprep.mubr.msk.bf16.mxu1 %vm880_vm5, %v4181_v29 }
 0x133   : > { %3034 = vmatmul.mubr.msk.bf16.gmra.mrb[24].mxu1 %vm880_vm5, %v4177_v52 }
 0x134   : > { %3037 = vmatprep.mubr.msk.bf16.mxu1 %vm880_vm5, %v877_v59 }
 0x13b   : > { %3038 = vmatmul.mubr.msk.bf16.gmra.mrb[28].mxu1 %vm880_vm5, %v879_v58 }
 0x180   : > { %v2963_v36 = vpop.f32.mrb[0].mxu1 }
 0x181   : > { %v1399_v21 = vpop.f32.mrb[1].mxu1 }
 0x182   : > { %v2964_v18 = vpop.f32.mrb[2].mxu1 }
 0x183   : > { %v1402_v55 = vpop.f32.mrb[3].mxu1 }
 0x18e   : > { %v2967_v7 = vpop.f32.mrb[4].mxu1 }
 0x18f   : > { %v1415_v13 = vpop.f32.mrb[5].mxu1 }
 0x190   : > { %v2968_v53 = vpop.f32.mrb[6].mxu1 }
 0x191   : > { %v1418_v30 = vpop.f32.mrb[7].mxu1 }
 0x19e   : > { %v2971_v4 = vpop.f32.mrb[8].mxu1 }
 0x19f   : > { %v1431_v19 = vpop.f32.mrb[9].mxu1 }
 0x1a0   : > { %v2972_v9 = vpop.f32.mrb[10].mxu1 }
 0x1a1   : > { %v4239_v29 = vpop.f32.mrb[11].mxu1 }
 0x1a9   : > { %v3059_v52 = vpop.f32.mrb[0].mxu0 }
 0x1aa   : > { %v3105_v35 = vadd.f32 %v3059_v52, %v2963_v36  ;;  %v1963_v1 = vpop.f32.mrb[1].mxu0 }
 0x1ab   : > { %v3106_v45 = vadd.f32 %v1963_v1, %v1399_v21  ;;  %v3060_v16 = vpop.f32.mrb[2].mxu0 }
 0x1ac   : > { %v3107_v2 = vadd.f32 %v3060_v16, %v2964_v18  ;;  %v1966_v39 = vpop.f32.mrb[3].mxu0  ;;  %v2161_v15 = vmul.f32 %v3105_v35, %v3105_v35 }
 0x1ad   : > { %v3108_v49 = vadd.f32 %v1966_v39, %v1402_v55  ;;  %v2159_v25 = vmul.f32 %v3106_v45, %v3106_v45 }
 0x1ae   : > { %v2785_v40 = vpack.c.bf16 %v3107_v2, %v3105_v35  ;;  %v4245_v47 = vpop.f32.mrb[12].mxu1  ;;  %v2162_v59 = vmul.f32 %v3107_v2, %v3107_v2 }
 0x1af   : > { %v2122_v62 = vadd.f32 %v3108_v49, %v3106_v45  ;;  %v2160_v50 = vmul.f32 %v3108_v49, %v3108_v49  ;;  %v2780_v34 = vpack.c.bf16 %v3108_v49, %v3106_v45  ;;  %v1447_v33 = vpop.f32.mrb[13].mxu1 }
 0x1b0   : > { %2858 = vst [vmem:[%s4247_s23 + $0x8] sm:$0xff] %v2785_v40   ;;  %v2976_v42 = vpop.f32.mrb[14].mxu1 }
 0x1b1   : > { %v2123_v5 = vadd.f32 %v3105_v35, %v2122_v62  ;;  %v2191_v14 = vadd.f32 %v2160_v50, %v2159_v25  ;;  %2781 = vst [vmem:[%s4247_s23] sm:$0xff] %v2780_v34   ;;  %v1450_v56 = vpop.f32.mrb[15].mxu1  ;;  %v3063_v8 = vpop.f32.mrb[4].mxu0 }
 0x1b2   : > { %v3109_v58 = vadd.f32 %v3063_v8, %v2967_v7  ;;  %v1979_v3 = vpop.f32.mrb[5].mxu0 }
 0x1b3   : > { %v2192_v26 = vadd.f32 %v2191_v14, %v2161_v15  ;;  %v3110_v24 = vadd.f32 %v1979_v3, %v1415_v13  ;;  %v2124_v57 = vadd.f32 %v3107_v2, %v2123_v5  ;;  %v3064_v63 = vpop.f32.mrb[6].mxu0 }
 0x1b4   : > { %v3111_v17 = vadd.f32 %v3064_v63, %v2968_v53  ;;  %v1982_v38 = vpop.f32.mrb[7].mxu0  ;;  %v2165_v44 = vmul.f32 %v3109_v58, %v3109_v58 }
 0x1b5   : > { %v2125_v31 = vadd.f32 %v3110_v24, %v2124_v57  ;;  %v2163_v10 = vmul.f32 %v3110_v24, %v3110_v24  ;;  %v2193_v48 = vadd.f32 %v2192_v26, %v2162_v59  ;;  %v3112_v37 = vadd.f32 %v1982_v38, %v1418_v30 }
 0x1b6   : > { %v2795_v43 = vpack.c.bf16 %v3111_v17, %v3109_v58  ;;  %v2166_v23 = vmul.f32 %v3111_v17, %v3111_v17 }
 0x1b7   : > { %v2194_v0 = vadd.f32 %v2193_v48, %v2163_v10  ;;  %v2126_v51 = vadd.f32 %v3112_v37, %v2125_v31  ;;  %v2164_v60 = vmul.f32 %v3112_v37, %v3112_v37  ;;  %v2790_v61 = vpack.c.bf16 %v3112_v37, %v3110_v24 }
 0x1b8   : > { %2860 = vst [vmem:[%s4247_s23 + $0x18] sm:$0xff] %v2795_v43  }
 0x1b9   : > { %v2127_v46 = vadd.f32 %v3109_v58, %v2126_v51  ;;  %v2195_v32 = vadd.f32 %v2194_v0, %v2164_v60  ;;  %2859 = vst [vmem:[%s4247_s23 + $0x10] sm:$0xff] %v2790_v61   ;;  %v3067_v6 = vpop.f32.mrb[8].mxu0 }
 0x1ba   : > { %v3113_v54 = vadd.f32 %v3067_v6, %v2971_v4  ;;  %v1995_v12 = vpop.f32.mrb[9].mxu0 }
 0x1bb   : > { %v2196_v41 = vadd.f32 %v2195_v32, %v2165_v44  ;;  %v3114_v20 = vadd.f32 %v1995_v12, %v1431_v19  ;;  %v2128_v27 = vadd.f32 %v3111_v17, %v2127_v46  ;;  %v3068_v22 = vpop.f32.mrb[10].mxu0 }
 0x1bc   : > { %v3115_v11 = vadd.f32 %v3068_v22, %v2972_v9  ;;  %v1998_v28 = vpop.f32.mrb[11].mxu0  ;;  %v2169_v52 = vmul.f32 %v3113_v54, %v3113_v54 }
 0x1bd   : > { %v2129_v36 = vadd.f32 %v3114_v20, %v2128_v27  ;;  %v2167_v21 = vmul.f32 %v3114_v20, %v3114_v20  ;;  %v2197_v18 = vadd.f32 %v2196_v41, %v2166_v23  ;;  %v3116_v55 = vadd.f32 %v1998_v28, %v4239_v29 }
 0x1be   : > { %v2805_v7 = vpack.c.bf16 %v3115_v11, %v3113_v54  ;;  %v2170_v16 = vmul.f32 %v3115_v11, %v3115_v11 }
 0x1bf   : > { %v2198_v13 = vadd.f32 %v2197_v18, %v2167_v21  ;;  %v2130_v53 = vadd.f32 %v3116_v55, %v2129_v36  ;;  %v2168_v30 = vmul.f32 %v3116_v55, %v3116_v55  ;;  %v2800_v4 = vpack.c.bf16 %v3116_v55, %v3114_v20 }
 0x1c0   : > { %2862 = vst [vmem:[%s4247_s23 + $0x28] sm:$0xff] %v2805_v7  }
 0x1c1   : > { %v2131_v35 = vadd.f32 %v3113_v54, %v2130_v53  ;;  %v2199_v1 = vadd.f32 %v2198_v13, %v2168_v30  ;;  %2861 = vst [vmem:[%s4247_s23 + $0x20] sm:$0xff] %v2800_v4   ;;  %v3071_v19 = vpop.f32.mrb[12].mxu0 }
 0x1c2   : > { %v3117_v45 = vadd.f32 %v3071_v19, %v4245_v47  ;;  %v2011_v9 = vpop.f32.mrb[13].mxu0 }
 0x1c3   : > { %v2200_v2 = vadd.f32 %v2199_v1, %v2169_v52  ;;  %v3118_v39 = vadd.f32 %v2011_v9, %v1447_v33  ;;  %v2132_v49 = vadd.f32 %v3115_v11, %v2131_v35  ;;  %v3072_v29 = vpop.f32.mrb[14].mxu0 }
 0x1c4   : > { %v3119_v40 = vadd.f32 %v3072_v29, %v2976_v42  ;;  %v2014_v25 = vpop.f32.mrb[15].mxu0  ;;  %v2173_v47 = vmul.f32 %v3117_v45, %v3117_v45 }
 0x1c5   : > { %v2133_v62 = vadd.f32 %v3118_v39, %v2132_v49  ;;  %v2171_v50 = vmul.f32 %v3118_v39, %v3118_v39  ;;  %v2201_v34 = vadd.f32 %v2200_v2, %v2170_v16  ;;  %v3120_v15 = vadd.f32 %v2014_v25, %v1450_v56 }
 0x1c6   : > { %v2815_v5 = vpack.c.bf16 %v3119_v40, %v3117_v45  ;;  %v2174_v57 = vmul.f32 %v3119_v40, %v3119_v40 }
 0x1c7   : > { %v2202_v14 = vadd.f32 %v2201_v34, %v2171_v50  ;;  %v2134_v8 = vadd.f32 %v3120_v15, %v2133_v62  ;;  %v2172_v58 = vmul.f32 %v3120_v15, %v3120_v15  ;;  %v2810_v3 = vpack.c.bf16 %v3120_v15, %v3118_v39 }
 0x1c8   : > { %2864 = vst [vmem:[%s4247_s23 + $0x38] sm:$0xff] %v2815_v5  }
 0x1c9   : > { %v2135_v59 = vadd.f32 %v3117_v45, %v2134_v8  ;;  %v2203_v26 = vadd.f32 %v2202_v14, %v2172_v58  ;;  %2863 = vst [vmem:[%s4247_s23 + $0x30] sm:$0xff] %v2810_v3   ;;  %v3075_v33 = vpop.f32.mrb[16].mxu0 }
 0x1ca   : > { %v2027_v24 = vpop.f32.mrb[17].mxu0 }
 0x1cb   : > { %v2204_v63 = vadd.f32 %v2203_v26, %v2173_v47  ;;  %v3076_v42 = vpop.f32.mrb[18].mxu0  ;;  %v2136_v17 = vadd.f32 %v3119_v40, %v2135_v59 }
 0x1cc   : > { %v2030_v38 = vpop.f32.mrb[19].mxu0 }
 0x1cd   : > { %v2205_v31 = vadd.f32 %v2204_v63, %v2174_v57 }
 0x1d1   : > { %v3079_v10 = vpop.f32.mrb[20].mxu0 }
 0x1d2   : > { %v2043_v56 = vpop.f32.mrb[21].mxu0 }
 0x1d3   : > { %v3080_v48 = vpop.f32.mrb[22].mxu0 }
 0x1d4   : > { %v2046_v37 = vpop.f32.mrb[23].mxu0 }
 0x1dc   : > { %v3083_v43 = vpop.f32.mrb[24].mxu0 }
 0x1dd   : > { %v2059_v0 = vpop.f32.mrb[25].mxu0 }
 0x1de   : > { %v3084_v51 = vpop.f32.mrb[26].mxu0 }
 0x1df   : > { %v2062_v60 = vpop.f32.mrb[27].mxu0 }
 0x1ec   : > { %v4259_v61 = vpop.f32.mrb[28].mxu0 }
 0x1ed   : > { %v4261_v44 = vpop.f32.mrb[29].mxu0 }
 0x1ee   : > { %v4263_v46 = vpop.f32.mrb[30].mxu0 }
 0x1ef   : > { %v4265_v32 = vpop.f32.mrb[31].mxu0 }
 0x1f6   : > { %v3027_v6 = vpop.f32.mrb[16].mxu1 }
 0x1f7   : > { %v3121_v54 = vadd.f32 %v3075_v33, %v3027_v6  ;;  %v1672_v12 = vpop.f32.mrb[17].mxu1 }
 0x1f8   : > { %v3122_v23 = vadd.f32 %v2027_v24, %v1672_v12  ;;  %v3028_v41 = vpop.f32.mrb[18].mxu1 }
 0x1f9   : > { %v3123_v20 = vadd.f32 %v3076_v42, %v3028_v41  ;;  %v1675_v27 = vpop.f32.mrb[19].mxu1  ;;  %v2177_v13 = vmul.f32 %v3121_v54, %v3121_v54 }
 0x1fa   : > { %v2137_v22 = vadd.f32 %v3122_v23, %v2136_v17  ;;  %v2175_v11 = vmul.f32 %v3122_v23, %v3122_v23  ;;  %v3124_v28 = vadd.f32 %v2030_v38, %v1675_v27 }
 0x1fb   : > { %v2825_v36 = vpack.c.bf16 %v3123_v20, %v3121_v54  ;;  %v2178_v1 = vmul.f32 %v3123_v20, %v3123_v20 }
 0x1fc   : > { %v2206_v21 = vadd.f32 %v2205_v31, %v2175_v11  ;;  %v2138_v18 = vadd.f32 %v3124_v28, %v2137_v22  ;;  %v2176_v55 = vmul.f32 %v3124_v28, %v3124_v28  ;;  %v2820_v7 = vpack.c.bf16 %v3124_v28, %v3122_v23 }
 0x1fd   : > { %2866 = vst [vmem:[%s4247_s23 + $0x48] sm:$0xff] %v2825_v36  }
 0x1fe   : > { %v2139_v53 = vadd.f32 %v3121_v54, %v2138_v18  ;;  %v2207_v30 = vadd.f32 %v2206_v21, %v2176_v55  ;;  %2865 = vst [vmem:[%s4247_s23 + $0x40] sm:$0xff] %v2820_v7   ;;  %v3031_v4 = vpop.f32.mrb[20].mxu1 }
 0x1ff   : > { %v3125_v52 = vadd.f32 %v3079_v10, %v3031_v4  ;;  %v1688_v35 = vpop.f32.mrb[21].mxu1 }
 0x200   : > { %v2208_v19 = vadd.f32 %v2207_v30, %v2177_v13  ;;  %v3126_v45 = vadd.f32 %v2043_v56, %v1688_v35  ;;  %v2140_v9 = vadd.f32 %v3123_v20, %v2139_v53  ;;  %v3032_v16 = vpop.f32.mrb[22].mxu1 }
 0x201   : > { %v3127_v2 = vadd.f32 %v3080_v48, %v3032_v16  ;;  %v1691_v39 = vpop.f32.mrb[23].mxu1  ;;  %v2181_v14 = vmul.f32 %v3125_v52, %v3125_v52 }
 0x202   : > { %v2141_v49 = vadd.f32 %v3126_v45, %v2140_v9  ;;  %v2179_v29 = vmul.f32 %v3126_v45, %v3126_v45  ;;  %v2209_v40 = vadd.f32 %v2208_v19, %v2178_v1  ;;  %v3128_v25 = vadd.f32 %v2046_v37, %v1691_v39 }
 0x203   : > { %v2835_v62 = vpack.c.bf16 %v3127_v2, %v3125_v52  ;;  %v2182_v26 = vmul.f32 %v3127_v2, %v3127_v2 }
 0x204   : > { %v2210_v50 = vadd.f32 %v2209_v40, %v2179_v29  ;;  %v2142_v34 = vadd.f32 %v3128_v25, %v2141_v49  ;;  %v2180_v15 = vmul.f32 %v3128_v25, %v3128_v25  ;;  %v2830_v5 = vpack.c.bf16 %v3128_v25, %v3126_v45 }
 0x205   : > { %2868 = vst [vmem:[%s4247_s23 + $0x58] sm:$0xff] %v2835_v62  }
 0x206   : > { %v2143_v8 = vadd.f32 %v3125_v52, %v2142_v34  ;;  %v2211_v58 = vadd.f32 %v2210_v50, %v2180_v15  ;;  %2867 = vst [vmem:[%s4247_s23 + $0x50] sm:$0xff] %v2830_v5   ;;  %v3035_v3 = vpop.f32.mrb[24].mxu1 }
 0x207   : > { %v3129_v47 = vadd.f32 %v3083_v43, %v3035_v3  ;;  %v1704_v59 = vpop.f32.mrb[25].mxu1 }
 0x208   : > { %v2212_v33 = vadd.f32 %v2211_v58, %v2181_v14  ;;  %v3130_v24 = vadd.f32 %v2059_v0, %v1704_v59  ;;  %v2144_v57 = vadd.f32 %v3127_v2, %v2143_v8  ;;  %v3036_v63 = vpop.f32.mrb[26].mxu1 }
 0x209   : > { %v3131_v42 = vadd.f32 %v3084_v51, %v3036_v63  ;;  %v1707_v17 = vpop.f32.mrb[27].mxu1  ;;  %v2185_v12 = vmul.f32 %v3129_v47, %v3129_v47 }
 0x20a   : > { %v2145_v38 = vadd.f32 %v3130_v24, %v2144_v57  ;;  %v2183_v31 = vmul.f32 %v3130_v24, %v3130_v24  ;;  %v2213_v10 = vadd.f32 %v2212_v33, %v2182_v26  ;;  %v3132_v56 = vadd.f32 %v2062_v60, %v1707_v17 }
 0x20b   : > { %v2845_v48 = vpack.c.bf16 %v3131_v42, %v3129_v47  ;;  %v2186_v27 = vmul.f32 %v3131_v42, %v3131_v42 }
 0x20c   : > { %v2214_v37 = vadd.f32 %v2213_v10, %v2183_v31  ;;  %v2146_v6 = vadd.f32 %v3132_v56, %v2145_v38  ;;  %v2184_v54 = vmul.f32 %v3132_v56, %v3132_v56  ;;  %v2840_v43 = vpack.c.bf16 %v3132_v56, %v3130_v24 }
 0x20d   : > { %2870 = vst [vmem:[%s4247_s23 + $0x68] sm:$0xff] %v2845_v48  }
 0x20e   : > { %v2147_v23 = vadd.f32 %v3129_v47, %v2146_v6  ;;  %v2215_v0 = vadd.f32 %v2214_v37, %v2184_v54  ;;  %2869 = vst [vmem:[%s4247_s23 + $0x60] sm:$0xff] %v2840_v43   ;;  %v3039_v41 = vpop.f32.mrb[28].mxu1 }
 0x20f   : > { %v3133_v51 = vadd.f32 %v4259_v61, %v3039_v41  ;;  %v1720_v20 = vpop.f32.mrb[29].mxu1 }
 0x210   : > { %v2216_v22 = vadd.f32 %v2215_v0, %v2185_v12  ;;  %v3134_v60 = vadd.f32 %v4261_v44, %v1720_v20  ;;  %v2148_v11 = vadd.f32 %v3131_v42, %v2147_v23  ;;  %v3040_v28 = vpop.f32.mrb[30].mxu1 }
 0x211   : > { %v3135_v36 = vadd.f32 %v4263_v46, %v3040_v28  ;;  %v1723_v21 = vpop.f32.mrb[31].mxu1  ;;  %v2189_v4 = vmul.f32 %v3133_v51, %v3133_v51 }
 0x212   : > { %v2149_v18 = vadd.f32 %v3134_v60, %v2148_v11  ;;  %v2187_v55 = vmul.f32 %v3134_v60, %v3134_v60  ;;  %v2217_v7 = vadd.f32 %v2216_v22, %v2186_v27  ;;  %v3136_v61 = vadd.f32 %v4265_v32, %v1723_v21 }
 0x213   : > { %v2855_v13 = vpack.c.bf16 %v3135_v36, %v3133_v51 }
 0x214   : > { %v2218_v44 = vadd.f32 %v2217_v7, %v2187_v55  ;;  %v2150_v53 = vadd.f32 %v3136_v61, %v2149_v18  ;;  %v2188_v30 = vmul.f32 %v3136_v61, %v3136_v61  ;;  %v2850_v46 = vpack.c.bf16 %v3136_v61, %v3134_v60 }
 0x215   : > { %2872 = vst [vmem:[%s4247_s23 + $0x78] sm:$0xff] %v2855_v13  }
 0x216   : > { %v2151_v52 = vadd.f32 %v3133_v51, %v2150_v53  ;;  %v2219_v32 = vadd.f32 %v2218_v44, %v2188_v30  ;;  %2871 = vst [vmem:[%s4247_s23 + $0x70] sm:$0xff] %v2850_v46  }
 0x217   : > { %3269 = shalt.err (!%p3266_p5)
}
 0x218   : > { %s3270_s22 = scalar_lea.hbm %s4282_s15, 2048  ;;  %s3274_s28 = scalar_lea.hbm %s4373_s6, 4096 }
 0x219   : > { %p3271_p6 = scmp.ne.s32.totalorder %s4282_s15, %s3270_s22  ;;  %p3275_p10 = scmp.lt.u32.totalorder %s4282_s15, %s4373_s6 }
 0x21a   : > { %p3276_p11 = scmp.lt.u32.totalorder %s3274_s28, %s3270_s22  ;;  %p3278_p13 = scmp.lt.u32.totalorder %s3270_s22, %s4282_s15 }
 0x21b   : > { %p3272_p7 = pnand %p3271_p6, %p3453_p4 }
 0x21c   : > { %p3277_p12 = por %p3276_p11, %p3275_p10 }
 0x21d   : > { %p3273_p9 = pneg %p3272_p7 }
 0x21e   : > { %p3279_p0 = por %p3278_p13, %p3277_p12 }
 0x220   : > { %p3280_p1 = pnand %p3279_p0, %p3273_p9 }
 0x222   : > { %3283 = shalt.err (!%p3280_p1)
}
 0x223   : > { %s3371_s16 = smov 64   ;;  %v2190_v35 = vmul.f32 %v3135_v36, %v3135_v36  ;;  %v2152_v1 = vadd.f32 %v3135_v36, %v2151_v52  ;;  %v2220_v19 = vadd.f32 %v2219_v32, %v2189_v4  ;;  %s2590_s17 = sshll.u32 %s4242_s29, 1 }
 0x224   : > { %3169 = dma.vmem_to_hbm [thread:$0]  (%p3453_p4), %s4284_s8, 2048, %s4282_s15, %s2392_s20, %s3371_s16, %s3371_s16, %s3368_s13  }
 0x225   : > { %v2153_v45 = vrot.slane %v2152_v1, 4  ;;  %v2221_v9 = vadd.f32 %v2220_v19, %v2190_v35  ;;  %s2737_s19 = sshll.u32 %s3358_s4, 5  ;;  %s401_s13 = scalar_lea.vmem [#allocation4], %s2590_s17 }
 0x226   : > { %s2430_s8 = sshll.u32 %s401_s13, 4  ;;  %s4318_s21 = scalar_lea.hbm %s4374_s7, %s2737_s19  ;;  %s4320_s8 = int_to_ptr.vmem [resolvable:$true] %s2430_s8 }
 0x227   : > { %v2154_v16 = vadd.f32 %v2153_v45, %v2152_v1  ;;  %v2222_v2 = vrot.slane %v2221_v9, 4  ;;  %s2397_s22 = scalar_lea.sflag [#allocation5], %s4242_s29  ;;  %s3284_s18 = scalar_lea.vmem %s4320_s8, 32 }
 0x228   : > { %p3285_p2 = scmp.ne.s32.totalorder %s4320_s8, %s3284_s18  ;;  %s3372_s4 = smov [#allocation4]  }
 0x229   : > { %v2155_v39 = vrot.slane %v2154_v16, 2  ;;  %v2223_v49 = vadd.f32 %v2222_v2, %v2221_v9  ;;  %s3288_s23 = sshll.u32 %s3372_s4, 4  ;;  %s3289_s23 = int_to_ptr.vmem [resolvable:$false] %s3288_s23 }
 0x22a   : > { %p3286_p3 = pnand %p3285_p2, %p3453_p4  ;;  %s3290_s28 = scalar_lea.vmem %s3289_s23, 64 }
 0x22b   : > { %v2156_v29 = vadd.f32 %v2155_v39, %v2154_v16  ;;  %v2224_v40 = vrot.slane %v2223_v49, 2  ;;  %p3291_p6 = scmp.lt.s32.totalorder %s4320_s8, %s3289_s23  ;;  %p3292_p7 = scmp.lt.s32.totalorder %s3290_s28, %s3284_s18 }
 0x22c   : > { %p3287_p5 = pneg %p3286_p3 }
 0x22d   : > { %v2157_v25 = vrot.slane %v2156_v29, 1  ;;  %v2225_v62 = vadd.f32 %v2224_v40, %v2223_v49  ;;  %p3293_p9 = por %p3292_p7, %p3291_p6 }
 0x22f   : > { %v2226_v50 = vrot.slane %v2225_v62, 1  ;;  %v2158_v34 = vadd.f32 %v2157_v25, %v2156_v29  ;;  %p3294_p10 = pnand %p3293_p9, %p3287_p5 }
 0x231   : > { %v2227_v15 = vadd.f32 %v2226_v50, %v2225_v62 }
 0x233   : > { %v2229_v5 = vsel %vm678_vm0, %v2158_v34, %v2227_v15 }
 0x234   : > { %2230 = vst [vmem:[%s401_s13] sm:$0x3] %v2229_v5 }
 0x235   : > { %3297 = shalt.err (!%p3294_p10)
}
 0x236   : > { %s3298_s29 = scalar_lea.hbm %s4318_s21, 32  ;;  %s3302_s16 = scalar_lea.hbm %s4374_s7, 64 }
 0x237   : > { %p3299_p11 = scmp.ne.s32.totalorder %s4318_s21, %s3298_s29  ;;  %p3303_p0 = scmp.lt.u32.totalorder %s4318_s21, %s4374_s7 }
 0x238   : > { %p3304_p1 = scmp.lt.u32.totalorder %s3302_s16, %s3298_s29  ;;  %p3306_p3 = scmp.lt.u32.totalorder %s3298_s29, %s4318_s21 }
 0x239   : > { %p3300_p12 = pnand %p3299_p11, %p3453_p4 }
 0x23a   : > { %p3305_p2 = por %p3304_p1, %p3303_p0 }
 0x23b   : > { %p3301_p13 = pneg %p3300_p12 }
 0x23c   : > { %p3307_p5 = por %p3306_p3, %p3305_p2 }
 0x23e   : > { %p3308_p6 = pnand %p3307_p5, %p3301_p13 }
 0x240   : > { %3311 = shalt.err (!%p3308_p6)
}
 0x241   : > { %3170 = dma.vmem_to_hbm [thread:$0]  (%p3453_p4), %s4320_s8, 32, %s4318_s21, %s2397_s22  }
 0x242 PF: > { %p3180_p7 = scmp.ge.s32.totalorder %s3366_s27, 2  ;;  %s2442_s13 = sand.u32 1, %s3346_s24  }
 0x243   : > { %s2443_s15 = scalar_lea.sflag [#allocation3], %s2442_s13 }
 0x244   : > { %p3174_p9 = pnand %p3180_p7, %p3460_p8 }
 0x246   : > { %3337 = dma.done.wait (!%p3174_p9), %s2443_s15, 2048  }
 0x247   : > { %3339 = vsyncadd (!%p3174_p9), %s2443_s15, 4294965248  ;;  %s2452_s20 = scalar_lea.sflag [#allocation5], %s2442_s13 }
 0x248   : > { %3341 = dma.done.wait (!%p3174_p9), %s2452_s20, 32  }
 0x249   : > { %3343 = vsyncadd (!%p3174_p9), %s2452_s20, 4294967264  ;;  %s24_s27 = sadd.s32 1, %s3366_s27   ;;  %s4379_s24 = smov %s3350_s25 }
 0x24a   : > { %p21_p10 = scmp.ge.s32.totalorder %s24_s27, 4   ;;  %s4380_s25 = smov %s3354_s3 }
 0x24b   : > { %s4381_s3 = smov %s3466_s12  ;;  %s4382_s4 = smov %s3362_s26 }
 0x24c   : > { %s4383_s26 = smov %s4385_s30  ;;  %23 = sbr.rel (!%p21_p10) target bundleno = 6 (0x6), region = 104 }
 0x253   :  { %2457 = vsyncpa [#allocation3], 1 }
 0x254   :  { %2459 = vsyncpa [#allocation3 + $0x1], 1 }
 0x255   :  { %2460 = vsyncpa [#allocation5], 1 }
 0x256   :  { %2462 = vsyncpa [#allocation5 + $0x1], 1 }

</bundles_post_ra>
